<compile_context>
chip_gen: v7x
topology: tpu7x:2x2x1
jax: 0.10.0
libtpu: 0.0.40
codegen_flags: <defaults>
</compile_context>

<pallas_src>
import numpy as np

import jax
import jax.numpy as jnp
from jax import lax
from jax.experimental import pallas as pl
from jax.experimental.pallas import tpu as pltpu

TAG_LANES = 128  # lane-dense output width for the emissions slab


# ----------------------------------------------------------------------------
# Pallas kernel: fused bi-directional LSTM recurrence + hid2tag linear
# (single grid point; all operands are tiny and live fully in VMEM).
# ----------------------------------------------------------------------------
def _bilstm_tagger_kernel(
    x_ref,        # (T*Bp, E)    f32  embedded inputs, time-major, batch-padded
    mask_ref,     # (T*Bp, 1)    f32  1.0 where t < X_lens[b] (0 for padded rows)
    w_ih_ref,     # (E, 8H)      f32  stacked [fwd | bwd] input weights
    b_ih_ref,     # (1, 8H)      f32  stacked (b_ih + b_hh) per direction
    w_hh_ref,     # (2H, 8H)     f32  block-diagonal [fwd->cols 0:4H, bwd->4H:8H]
    h0f_ref,      # (Bp, H)      f32  init_hidden() slices (zero-padded rows)
    c0f_ref,      # (Bp, H)      f32
    h0b_ref,      # (Bp, H)      f32
    c0b_ref,      # (Bp, H)      f32
    w_out_ref,    # (2H, TAGP)   f32  hid2tag.T zero-padded to 128 lanes
    b_out_ref,    # (1, TAGP)    f32
    emis_ref,     # out: (T*Bp, TAGP) f32  lane-dense emissions slab
    xproj_ref,    # scratch: (T*Bp, 8H) f32
    hid_ref,      # scratch: (T*Bp, 2H) f32  [fwd | bwd] LSTM outputs
):
    Bp, H = h0f_ref.shape
    T = x_ref.shape[0] // Bp
    H4 = 4 * H

    # --- hoisted input projection for BOTH directions, biases folded in -------
    # One (T*Bp, E) x (E, 8H) MXU pass instead of 2*T tiny per-step matmuls.
    xproj_ref[...] = (
        jnp.dot(x_ref[...], w_ih_ref[...], preferred_element_type=jnp.float32)
        + b_ih_ref[...]
    )

    w_hh = w_hh_ref[...]

    def cell(gates, c):
        # Full-width activations, then lane slices of the 4H gate block.
        sig = jax.nn.sigmoid(gates)
        th = jnp.tanh(gates)
        i = sig[:, 0 * H:1 * H]
        f = sig[:, 1 * H:2 * H]
        g = th[:, 2 * H:3 * H]
        o = sig[:, 3 * H:4 * H]
        c_new = f * c + i * g
        h_new = o * jnp.tanh(c_new)
        return h_new, c_new

    # --- fused forward + backward recurrence (single loop) --------------------
    def body(t, carry):
        h_f, c_f, h_b, c_b = carry
        off_f = pl.multiple_of(t * Bp, Bp)
        off_b = pl.multiple_of((T - 1 - t) * Bp, Bp)

        # Hoisted mask compares (reused by every where below).
        m_f = mask_ref[pl.ds(off_f, Bp), :] > 0.0     # (Bp, 1) bool
        m_b = mask_ref[pl.ds(off_b, Bp), :] > 0.0

        # One block-diagonal recurrent matmul for both directions: K=2H, N=8H.
        hg = jnp.dot(jnp.concatenate([h_f, h_b], axis=1), w_hh,
                     preferred_element_type=jnp.float32)          # (Bp, 8H)

        gates_f = xproj_ref[pl.ds(off_f, Bp), pl.ds(0, H4)] + hg[:, :H4]
        gates_b = xproj_ref[pl.ds(off_b, Bp), pl.ds(H4, H4)] + hg[:, H4:]

        hf_new, cf_new = cell(gates_f, c_f)
        hb_new, cb_new = cell(gates_b, c_b)

        h_f = jnp.where(m_f, hf_new, h_f)
        c_f = jnp.where(m_f, cf_new, c_f)
        h_b = jnp.where(m_b, hb_new, h_b)
        c_b = jnp.where(m_b, cb_new, c_b)

        # Padded steps -> zeros (pad_packed_sequence semantics). Merged scratch:
        # fwd half in lanes [0, H), bwd half in [H, 2H).
        hid_ref[pl.ds(off_f, Bp), pl.ds(0, H)] = jnp.where(m_f, hf_new, 0.0)
        hid_ref[pl.ds(off_b, Bp), pl.ds(H, H)] = jnp.where(m_b, hb_new, 0.0)
        return h_f, c_f, h_b, c_b

    unroll = True if T <= 16 else 8   # full unroll only for small T
    lax.fori_loop(
        0, T, body,
        (h0f_ref[...], c0f_ref[...], h0b_ref[...], c0b_ref[...]),
        unroll=unroll,
    )

    # --- hid2tag linear: single K=2H dot against the 128-lane padded weight ---
    emis_ref[...] = (
        jnp.dot(hid_ref[...], w_out_ref[...], preferred_element_type=jnp.float32)
        + b_out_ref[...]
    )


# ----------------------------------------------------------------------------
# One-time parameter packing (out of the per-call hot path)
# ----------------------------------------------------------------------------
def pack_params(p, batch_sz):
    H = p["w_hh_f"].shape[1]
    tag_sz = p["w_out"].shape[0]
    Bp = ((batch_sz + 7) // 8) * 8
    tag_p = max(TAG_LANES, ((tag_sz + TAG_LANES - 1) // TAG_LANES) * TAG_LANES)

    # Stacked input weights / folded biases for one hoisted projection.
    w_ih = jnp.concatenate([p["w_ih_f"].T, p["w_ih_b"].T], axis=1)        # (E, 8H)
    b_ih = jnp.concatenate(
        [p["b_ih_f"] + p["b_hh_f"], p["b_ih_b"] + p["b_hh_b"]]).reshape(1, 8 * H)

    # Block-diagonal recurrent weight: rows [0,H)=fwd -> cols [0,4H),
    # rows [H,2H)=bwd -> cols [4H,8H).
    w_hh = jnp.zeros((2 * H, 8 * H), jnp.float32)
    w_hh = w_hh.at[:H, :4 * H].set(p["w_hh_f"].T)
    w_hh = w_hh.at[H:, 4 * H:].set(p["w_hh_b"].T)

    # hid2tag weight/bias padded to a lane-dense 128-wide output.
    w_out = jnp.zeros((2 * H, tag_p), jnp.float32).at[:, :tag_sz].set(p["w_out"].T)
    b_out = jnp.zeros((1, tag_p), jnp.float32).at[:, :tag_sz].set(p["b_out"])

    def pad_b(a):
        return jnp.pad(a, ((0, Bp - batch_sz), (0, 0)))

    return dict(
        embedding=p["embedding"].astype(jnp.float32),
        w_ih=w_ih, b_ih=b_ih, w_hh=w_hh,
        h0f=pad_b(p["h0"][0]), c0f=pad_b(p["c0"][0]),
        h0b=pad_b(p["h0"][1]), c0b=pad_b(p["c0"][1]),
        w_out=w_out, b_out=b_out,
    )


# ----------------------------------------------------------------------------
# JAX wrapper (per-call glue: embedding gather, batch pad, mask, pallas_call)
# ----------------------------------------------------------------------------
def pos_tagger_forward(X, X_lens, pk, *, tag_sz):
    """X: (B, T) int32 token ids.  X_lens: (B,) int32.  Returns (emissions, Y_hat)."""
    B, T = X.shape
    E = pk["w_ih"].shape[0]
    H = pk["h0f"].shape[1]
    Bp = pk["h0f"].shape[0]
    tag_p = pk["w_out"].shape[1]
    assert B <= Bp

    # Embedding lookup directly in time-major order (padding_idx row is zero;
    # padded batch rows are fully masked downstream anyway).
    # TODO(synk): nn.Dropout(p=dr) is active only in training; eval-mode forward is identity.
    X_p = jnp.pad(X, ((0, Bp - B), (0, 0)))                               # (Bp, T)
    x_flat = jnp.take(pk["embedding"], X_p.T, axis=0).reshape(T * Bp, E)  # (T*Bp, E)

    lens_p = jnp.pad(X_lens.astype(jnp.int32), (0, Bp - B))
    mask_flat = (jnp.arange(T, dtype=jnp.int32)[:, None] < lens_p[None, :]
                 ).astype(jnp.float32).reshape(T * Bp, 1)

    args = (x_flat, mask_flat, pk["w_ih"], pk["b_ih"], pk["w_hh"],
            pk["h0f"], pk["c0f"], pk["h0b"], pk["c0b"], pk["w_out"], pk["b_out"])

    # TODO(synk): v7x — when Bp >= 16 add a leading batch-block grid axis with
    # dimension_semantics=("parallel",) to use both TensorCores; and once the
    # (T*Bp, 8H) xproj scratch approaches the 32 MiB scoped-VMEM default, chunk
    # the hoisted projection over time and set vmem_limit_bytes explicitly.
    vmem = pl.BlockSpec(memory_space=pltpu.MemorySpace.VMEM)
    emis_flat = pl.pallas_call(
        _bilstm_tagger_kernel,
        out_shape=jax.ShapeDtypeStruct((T * Bp, tag_p), jnp.float32),
        in_specs=[vmem] * len(args),
        out_specs=vmem,
        scratch_shapes=[
            pltpu.VMEM((T * Bp, 8 * H), jnp.float32),   # hoisted x-projection
            pltpu.VMEM((T * Bp, 2 * H), jnp.float32),   # [fwd | bwd] LSTM outputs
        ],
    )(*args)

    emissions = jnp.transpose(
        emis_flat.reshape(T, Bp, tag_p), (1, 0, 2))[:B, :, :tag_sz]
    # log_softmax dropped before argmax: argmax is invariant to it.
    y_hat = jnp.argmax(emissions, axis=-1).astype(jnp.int32)
    return emissions, y_hat


# ----------------------------------------------------------------------------
# Deterministic parameter construction (mirrors the nn.Module __init__ shapes)
# ----------------------------------------------------------------------------
def make_params(key, voc_sz, edim, hdim, tag_sz, padix, batch_sz, lstm_layers=1):
    ks = jax.random.split(key, 13)
    bl = 1.0 / np.sqrt(hdim)
    bo = 1.0 / np.sqrt(2 * hdim)

    def u(k, shape, b):
        return jax.random.uniform(k, shape, jnp.float32, -b, b)

    emb = jax.random.normal(ks[0], (voc_sz, edim), jnp.float32)
    emb = emb.at[padix].set(0.0)  # padding_idx row is zero
    return dict(
        embedding=emb,
        w_ih_f=u(ks[1], (4 * hdim, edim), bl),
        w_hh_f=u(ks[2], (4 * hdim, hdim), bl),
        b_ih_f=u(ks[3], (4 * hdim,), bl),
        b_hh_f=u(ks[4], (4 * hdim,), bl),
        w_ih_b=u(ks[5], (4 * hdim, edim), bl),
        w_hh_b=u(ks[6], (4 * hdim, hdim), bl),
        b_ih_b=u(ks[7], (4 * hdim,), bl),
        b_hh_b=u(ks[8], (4 * hdim,), bl),
        w_out=u(ks[9], (tag_sz, 2 * hdim), bo),
        b_out=u(ks[10], (tag_sz,), bo),
        # init_hidden(): deterministic stand-in for torch.randn(2*layers, B, H)
        h0=jax.random.normal(ks[11], (2 * lstm_layers, batch_sz, hdim), jnp.float32),
        c0=jax.random.normal(ks[12], (2 * lstm_layers, batch_sz, hdim), jnp.float32),
    )


# ----------------------------------------------------------------------------
# Pure-numpy reference of the same forward pass (packed-sequence semantics)
# ----------------------------------------------------------------------------
def ref_forward(X_np, X_lens, p):
    def sig(z):
        return 1.0 / (1.0 + np.exp(-z))

    emb = np.asarray(p["embedding"])
    B, T = X_np.shape
    H = p["w_hh_f"].shape[1]
    tag_sz = p["w_out"].shape[0]
    w_ih = [np.asarray(p["w_ih_f"]), np.asarray(p["w_ih_b"])]
    w_hh = [np.asarray(p["w_hh_f"]), np.asarray(p["w_hh_b"])]
    bias = [np.asarray(p["b_ih_f"]) + np.asarray(p["b_hh_f"]),
            np.asarray(p["b_ih_b"]) + np.asarray(p["b_hh_b"])]
    h0 = np.asarray(p["h0"])
    c0 = np.asarray(p["c0"])

    x = emb[X_np]  # (B, T, E)
    out = np.zeros((B, T, 2 * H), np.float32)
    for b in range(B):
        L = int(X_lens[b])
        # forward direction
        h, c = h0[0, b].copy(), c0[0, b].copy()
        for t in range(L):
            g = x[b, t] @ w_ih[0].T + h @ w_hh[0].T + bias[0]
            i, f, gg, o = sig(g[:H]), sig(g[H:2 * H]), np.tanh(g[2 * H:3 * H]), sig(g[3 * H:])
            c = f * c + i * gg
            h = o * np.tanh(c)
            out[b, t, :H] = h
        # reverse direction
        h, c = h0[1, b].copy(), c0[1, b].copy()
        for t in range(L - 1, -1, -1):
            g = x[b, t] @ w_ih[1].T + h @ w_hh[1].T + bias[1]
            i, f, gg, o = sig(g[:H]), sig(g[H:2 * H]), np.tanh(g[2 * H:3 * H]), sig(g[3 * H:])
            c = f * c + i * gg
            h = o * np.tanh(c)
            out[b, t, H:] = h

    emis = out.reshape(B * T, 2 * H) @ np.asarray(p["w_out"]).T + np.asarray(p["b_out"])
    emis = emis.reshape(B, T, tag_sz)
    mx = emis.max(-1, keepdims=True)
    logp = emis - mx - np.log(np.exp(emis - mx).sum(-1, keepdims=True))
    return emis, logp.argmax(-1)


if __name__ == "__main__":
    # Small shapes consistent with the module constructor.
    edim, hdim, voc_sz, tag_sz = 32, 32, 50, 8
    padix, batch_sz, lstm_layers = 0, 2, 1
    T = 8

    key = jax.random.PRNGKey(0)
    kp, kx = jax.random.split(key)
    params = make_params(kp, voc_sz, edim, hdim, tag_sz, padix, batch_sz, lstm_layers)
    packed = pack_params(params, batch_sz)          # one-time, out of the hot path

    X_lens_list = [8, 5]  # sorted descending, as pack_padded_sequence expects
    lens = jnp.asarray(X_lens_list, dtype=jnp.int32)
    X = jax.random.randint(kx, (batch_sz, T), 1, voc_sz, dtype=jnp.int32)
    X = jnp.where(jnp.arange(T)[None, :] < lens[:, None], X, padix)

    fwd = jax.jit(pos_tagger_forward, static_argnames=("tag_sz",))
    emissions, y_hat = fwd(X, lens, packed, tag_sz=tag_sz)
    jax.block_until_ready((emissions, y_hat))

    # Verify against pure-numpy reference of the same forward pass.
    ref_emis, ref_yhat = ref_forward(np.asarray(X), X_lens_list, params)
    np.testing.assert_allclose(np.asarray(emissions), ref_emis, rtol=1e-4, atol=1e-4)
    for i in range(batch_sz):
        assert np.array_equal(
            np.asarray(y_hat)[i, :X_lens_list[i]], ref_yhat[i, :X_lens_list[i]]
        )

    # forward() return value: list of per-sequence predictions trimmed to length
    preds = [np.asarray(y_hat)[i, :X_lens_list[i]] for i in range(batch_sz)]
    assert len(preds) == batch_sz

    print("KERNEL_OK")
</pallas_src>

<mosaic_0001>
module attributes {stable_mosaic.version = 11 : i64} {
  func.func @_bilstm_tagger_kernel(%arg0: memref<64x32xf32, #tpu.memory_space<vmem>>, %arg1: memref<64x1xf32, #tpu.memory_space<vmem>>, %arg2: memref<32x256xf32, #tpu.memory_space<vmem>>, %arg3: memref<1x256xf32, #tpu.memory_space<vmem>>, %arg4: memref<64x256xf32, #tpu.memory_space<vmem>>, %arg5: memref<8x32xf32, #tpu.memory_space<vmem>>, %arg6: memref<8x32xf32, #tpu.memory_space<vmem>>, %arg7: memref<8x32xf32, #tpu.memory_space<vmem>>, %arg8: memref<8x32xf32, #tpu.memory_space<vmem>>, %arg9: memref<64x128xf32, #tpu.memory_space<vmem>>, %arg10: memref<1x128xf32, #tpu.memory_space<vmem>>, %arg11: memref<64x128xf32, #tpu.memory_space<vmem>>, %arg12: memref<64x256xf32, #tpu.memory_space<vmem>>, %arg13: memref<64x64xf32, #tpu.memory_space<vmem>>) attributes {dimension_semantics = [], scalar_prefetch = 0 : i64, scratch_operands = 2 : i64, tpu.core_type = #tpu.core_type<tc>} {
    %c0 = arith.constant 0 : index
    %c0_0 = arith.constant 0 : index
    %0 = vector.load %arg0[%c0, %c0_0] : memref<64x32xf32, #tpu.memory_space<vmem>>, vector<64x32xf32>
    %c0_1 = arith.constant 0 : index
    %c0_2 = arith.constant 0 : index
    %1 = vector.load %arg2[%c0_1, %c0_2] : memref<32x256xf32, #tpu.memory_space<vmem>>, vector<32x256xf32>
    %cst = arith.constant dense<0.000000e+00> : vector<64x256xf32>
    %2 = tpu.matmul %0, %1, %cst {dimension_numbers = #tpu.dot_dimension_numbers<[1], [0], [0], [1], [0, 0, 1, 1], [], []>} : vector<64x32xf32>, vector<32x256xf32>, vector<64x256xf32> -> vector<64x256xf32>
    %c0_3 = arith.constant 0 : index
    %c0_4 = arith.constant 0 : index
    %3 = vector.load %arg3[%c0_3, %c0_4] : memref<1x256xf32, #tpu.memory_space<vmem>>, vector<1x256xf32>
    %4 = vector.broadcast %3 : vector<1x256xf32> to vector<64x256xf32>
    %5 = arith.addf %2, %4 : vector<64x256xf32>
    %c0_5 = arith.constant 0 : index
    %c0_6 = arith.constant 0 : index
    %6 = vector.load %arg12[%c0_5, %c0_6] : memref<64x256xf32, #tpu.memory_space<vmem>>, vector<64x256xf32>
    tpu.vector_store %arg12[%c0_5, %c0_6], %5 {strides = array<i32>} : memref<64x256xf32, #tpu.memory_space<vmem>>, vector<64x256xf32>,
    %c0_7 = arith.constant 0 : index
    %c0_8 = arith.constant 0 : index
    %7 = vector.load %arg4[%c0_7, %c0_8] : memref<64x256xf32, #tpu.memory_space<vmem>>, vector<64x256xf32>
    %c0_9 = arith.constant 0 : index
    %c0_10 = arith.constant 0 : index
    %8 = vector.load %arg5[%c0_9, %c0_10] : memref<8x32xf32, #tpu.memory_space<vmem>>, vector<8x32xf32>
    %c0_11 = arith.constant 0 : index
    %c0_12 = arith.constant 0 : index
    %9 = vector.load %arg6[%c0_11, %c0_12] : memref<8x32xf32, #tpu.memory_space<vmem>>, vector<8x32xf32>
    %c0_13 = arith.constant 0 : index
    %c0_14 = arith.constant 0 : index
    %10 = vector.load %arg7[%c0_13, %c0_14] : memref<8x32xf32, #tpu.memory_space<vmem>>, vector<8x32xf32>
    %c0_15 = arith.constant 0 : index
    %c0_16 = arith.constant 0 : index
    %11 = vector.load %arg8[%c0_15, %c0_16] : memref<8x32xf32, #tpu.memory_space<vmem>>, vector<8x32xf32>
    %c0_i32 = arith.constant 0 : i32
    %c8_i32 = arith.constant 8 : i32
    %12 = arith.muli %c0_i32, %c8_i32 : i32
    %13 = tpu.assume_multiple %12, 8 : i32
    %c7_i32 = arith.constant 7 : i32
    %14 = arith.subi %c7_i32, %c0_i32 : i32
    %c8_i32_17 = arith.constant 8 : i32
    %15 = arith.muli %14, %c8_i32_17 : i32
    %16 = tpu.assume_multiple %15, 8 : i32
    %17 = arith.index_cast %13 : i32 to index
    %c0_18 = arith.constant 0 : index
    %18 = vector.load %arg1[%17, %c0_18] : memref<64x1xf32, #tpu.memory_space<vmem>>, vector<8x1xf32>
    %cst_19 = arith.constant 0.000000e+00 : f32
    %19 = vector.broadcast %cst_19 : f32 to vector<8x1xf32>
    %20 = arith.cmpf ogt, %18, %19 : vector<8x1xf32>
    %21 = arith.index_cast %16 : i32 to index
    %c0_20 = arith.constant 0 : index
    %22 = vector.load %arg1[%21, %c0_20] : memref<64x1xf32, #tpu.memory_space<vmem>>, vector<8x1xf32>
    %cst_21 = arith.constant 0.000000e+00 : f32
    %23 = vector.broadcast %cst_21 : f32 to vector<8x1xf32>
    %24 = arith.cmpf ogt, %22, %23 : vector<8x1xf32>
    %25 = tpu.concatenate %8, %10 in 1 : vector<8x32xf32>, vector<8x32xf32> -> vector<8x64xf32>
    %cst_22 = arith.constant dense<0.000000e+00> : vector<8x256xf32>
    %26 = tpu.matmul %25, %7, %cst_22 {dimension_numbers = #tpu.dot_dimension_numbers<[1], [0], [0], [1], [0, 0, 1, 1], [], []>} : vector<8x64xf32>, vector<64x256xf32>, vector<8x256xf32> -> vector<8x256xf32>
    %27 = arith.index_cast %13 : i32 to index
    %c0_23 = arith.constant 0 : index
    %28 = vector.load %arg12[%27, %c0_23] : memref<64x256xf32, #tpu.memory_space<vmem>>, vector<8x128xf32>
    %29 = vector.extract_strided_slice %26 {offsets = [0, 0], sizes = [8, 128], strides = [1, 1]} : vector<8x256xf32> to vector<8x128xf32>
    %30 = arith.addf %28, %29 : vector<8x128xf32>
    %31 = arith.index_cast %16 : i32 to index
    %c128 = arith.constant 128 : index
    %32 = vector.load %arg12[%31, %c128] : memref<64x256xf32, #tpu.memory_space<vmem>>, vector<8x128xf32>
    %33 = vector.extract_strided_slice %26 {offsets = [0, 128], sizes = [8, 128], strides = [1, 1]} : vector<8x256xf32> to vector<8x128xf32>
    %34 = arith.addf %32, %33 : vector<8x128xf32>
    %35 = arith.negf %30 : vector<8x128xf32>
    %36 = math.exp %35 : vector<8x128xf32>
    %cst_24 = arith.constant 1.000000e+00 : f32
    %37 = vector.broadcast %cst_24 : f32 to vector<8x128xf32>
    %38 = arith.addf %37, %36 : vector<8x128xf32>
    %39 = arith.divf %37, %38 : vector<8x128xf32>
    %40 = math.tanh %30 : vector<8x128xf32>
    %41 = vector.extract_strided_slice %39 {offsets = [0, 0], sizes = [8, 32], strides = [1, 1]} : vector<8x128xf32> to vector<8x32xf32>
    %42 = vector.extract_strided_slice %39 {offsets = [0, 32], sizes = [8, 32], strides = [1, 1]} : vector<8x128xf32> to vector<8x32xf32>
    %43 = vector.extract_strided_slice %40 {offsets = [0, 64], sizes = [8, 32], strides = [1, 1]} : vector<8x128xf32> to vector<8x32xf32>
    %44 = vector.extract_strided_slice %39 {offsets = [0, 96], sizes = [8, 32], strides = [1, 1]} : vector<8x128xf32> to vector<8x32xf32>
    %45 = arith.mulf %42, %9 : vector<8x32xf32>
    %46 = arith.mulf %41, %43 : vector<8x32xf32>
    %47 = arith.addf %45, %46 : vector<8x32xf32>
    %48 = math.tanh %47 : vector<8x32xf32>
    %49 = arith.mulf %44, %48 : vector<8x32xf32>
    %50 = arith.negf %34 : vector<8x128xf32>
    %51 = math.exp %50 : vector<8x128xf32>
    %cst_25 = arith.constant 1.000000e+00 : f32
    %52 = vector.broadcast %cst_25 : f32 to vector<8x128xf32>
    %53 = arith.addf %52, %51 : vector<8x128xf32>
    %54 = arith.divf %52, %53 : vector<8x128xf32>
    %55 = math.tanh %34 : vector<8x128xf32>
    %56 = vector.extract_strided_slice %54 {offsets = [0, 0], sizes = [8, 32], strides = [1, 1]} : vector<8x128xf32> to vector<8x32xf32>
    %57 = vector.extract_strided_slice %54 {offsets = [0, 32], sizes = [8, 32], strides = [1, 1]} : vector<8x128xf32> to vector<8x32xf32>
    %58 = vector.extract_strided_slice %55 {offsets = [0, 64], sizes = [8, 32], strides = [1, 1]} : vector<8x128xf32> to vector<8x32xf32>
    %59 = vector.extract_strided_slice %54 {offsets = [0, 96], sizes = [8, 32], strides = [1, 1]} : vector<8x128xf32> to vector<8x32xf32>
    %60 = arith.mulf %57, %11 : vector<8x32xf32>
    %61 = arith.mulf %56, %58 : vector<8x32xf32>
    %62 = arith.addf %60, %61 : vector<8x32xf32>
    %63 = math.tanh %62 : vector<8x32xf32>
    %64 = arith.mulf %59, %63 : vector<8x32xf32>
    %65 = vector.shape_cast %20 : vector<8x1xi1> to vector<8x1xi1>
    %66 = vector.broadcast %65 : vector<8x1xi1> to vector<8x32xi1>
    %67 = arith.select %66, %49, %8 : vector<8x32xi1>, vector<8x32xf32>
    %68 = vector.shape_cast %20 : vector<8x1xi1> to vector<8x1xi1>
    %69 = vector.broadcast %68 : vector<8x1xi1> to vector<8x32xi1>
    %70 = arith.select %69, %47, %9 : vector<8x32xi1>, vector<8x32xf32>
    %71 = vector.shape_cast %24 : vector<8x1xi1> to vector<8x1xi1>
    %72 = vector.broadcast %71 : vector<8x1xi1> to vector<8x32xi1>
    %73 = arith.select %72, %64, %10 : vector<8x32xi1>, vector<8x32xf32>
    %74 = vector.shape_cast %24 : vector<8x1xi1> to vector<8x1xi1>
    %75 = vector.broadcast %74 : vector<8x1xi1> to vector<8x32xi1>
    %76 = arith.select %75, %62, %11 : vector<8x32xi1>, vector<8x32xf32>
    %cst_26 = arith.constant 0.000000e+00 : f32
    %77 = vector.shape_cast %20 : vector<8x1xi1> to vector<8x1xi1>
    %78 = vector.broadcast %77 : vector<8x1xi1> to vector<8x32xi1>
    %79 = vector.broadcast %cst_26 : f32 to vector<8x32xf32>
    %80 = arith.select %78, %49, %79 : vector<8x32xi1>, vector<8x32xf32>
    %81 = arith.index_cast %13 : i32 to index
    %c0_27 = arith.constant 0 : index
    %82 = vector.load %arg13[%81, %c0_27] : memref<64x64xf32, #tpu.memory_space<vmem>>, vector<8x32xf32>
    tpu.vector_store %arg13[%81, %c0_27], %80 {strides = array<i32>} : memref<64x64xf32, #tpu.memory_space<vmem>>, vector<8x32xf32>,
    %cst_28 = arith.constant 0.000000e+00 : f32
    %83 = vector.shape_cast %24 : vector<8x1xi1> to vector<8x1xi1>
    %84 = vector.broadcast %83 : vector<8x1xi1> to vector<8x32xi1>
    %85 = vector.broadcast %cst_28 : f32 to vector<8x32xf32>
    %86 = arith.select %84, %64, %85 : vector<8x32xi1>, vector<8x32xf32>
    %87 = arith.index_cast %16 : i32 to index
    %c32 = arith.constant 32 : index
    %88 = vector.load %arg13[%87, %c32] : memref<64x64xf32, #tpu.memory_space<vmem>>, vector<8x32xf32>
    tpu.vector_store %arg13[%87, %c32], %86 {strides = array<i32>} : memref<64x64xf32, #tpu.memory_space<vmem>>, vector<8x32xf32>,
    %c1_i32 = arith.constant 1 : i32
    %c8_i32_29 = arith.constant 8 : i32
    %89 = arith.muli %c1_i32, %c8_i32_29 : i32
    %90 = tpu.assume_multiple %89, 8 : i32
    %c7_i32_30 = arith.constant 7 : i32
    %91 = arith.subi %c7_i32_30, %c1_i32 : i32
    %c8_i32_31 = arith.constant 8 : i32
    %92 = arith.muli %91, %c8_i32_31 : i32
    %93 = tpu.assume_multiple %92, 8 : i32
    %94 = arith.index_cast %90 : i32 to index
    %c0_32 = arith.constant 0 : index
    %95 = vector.load %arg1[%94, %c0_32] : memref<64x1xf32, #tpu.memory_space<vmem>>, vector<8x1xf32>
    %cst_33 = arith.constant 0.000000e+00 : f32
    %96 = vector.broadcast %cst_33 : f32 to vector<8x1xf32>
    %97 = arith.cmpf ogt, %95, %96 : vector<8x1xf32>
    %98 = arith.index_cast %93 : i32 to index
    %c0_34 = arith.constant 0 : index
    %99 = vector.load %arg1[%98, %c0_34] : memref<64x1xf32, #tpu.memory_space<vmem>>, vector<8x1xf32>
    %cst_35 = arith.constant 0.000000e+00 : f32
    %100 = vector.broadcast %cst_35 : f32 to vector<8x1xf32>
    %101 = arith.cmpf ogt, %99, %100 : vector<8x1xf32>
    %102 = tpu.concatenate %67, %73 in 1 : vector<8x32xf32>, vector<8x32xf32> -> vector<8x64xf32>
    %cst_36 = arith.constant dense<0.000000e+00> : vector<8x256xf32>
    %103 = tpu.matmul %102, %7, %cst_36 {dimension_numbers = #tpu.dot_dimension_numbers<[1], [0], [0], [1], [0, 0, 1, 1], [], []>} : vector<8x64xf32>, vector<64x256xf32>, vector<8x256xf32> -> vector<8x256xf32>
    %104 = arith.index_cast %90 : i32 to index
    %c0_37 = arith.constant 0 : index
    %105 = vector.load %arg12[%104, %c0_37] : memref<64x256xf32, #tpu.memory_space<vmem>>, vector<8x128xf32>
    %106 = vector.extract_strided_slice %103 {offsets = [0, 0], sizes = [8, 128], strides = [1, 1]} : vector<8x256xf32> to vector<8x128xf32>
    %107 = arith.addf %105, %106 : vector<8x128xf32>
    %108 = arith.index_cast %93 : i32 to index
    %c128_38 = arith.constant 128 : index
    %109 = vector.load %arg12[%108, %c128_38] : memref<64x256xf32, #tpu.memory_space<vmem>>, vector<8x128xf32>
    %110 = vector.extract_strided_slice %103 {offsets = [0, 128], sizes = [8, 128], strides = [1, 1]} : vector<8x256xf32> to vector<8x128xf32>
    %111 = arith.addf %109, %110 : vector<8x128xf32>
    %112 = arith.negf %107 : vector<8x128xf32>
    %113 = math.exp %112 : vector<8x128xf32>
    %cst_39 = arith.constant 1.000000e+00 : f32
    %114 = vector.broadcast %cst_39 : f32 to vector<8x128xf32>
    %115 = arith.addf %114, %113 : vector<8x128xf32>
    %116 = arith.divf %114, %115 : vector<8x128xf32>
    %117 = math.tanh %107 : vector<8x128xf32>
    %118 = vector.extract_strided_slice %116 {offsets = [0, 0], sizes = [8, 32], strides = [1, 1]} : vector<8x128xf32> to vector<8x32xf32>
    %119 = vector.extract_strided_slice %116 {offsets = [0, 32], sizes = [8, 32], strides = [1, 1]} : vector<8x128xf32> to vector<8x32xf32>
    %120 = vector.extract_strided_slice %117 {offsets = [0, 64], sizes = [8, 32], strides = [1, 1]} : vector<8x128xf32> to vector<8x32xf32>
    %121 = vector.extract_strided_slice %116 {offsets = [0, 96], sizes = [8, 32], strides = [1, 1]} : vector<8x128xf32> to vector<8x32xf32>
    %122 = arith.mulf %119, %70 : vector<8x32xf32>
    %123 = arith.mulf %118, %120 : vector<8x32xf32>
    %124 = arith.addf %122, %123 : vector<8x32xf32>
    %125 = math.tanh %124 : vector<8x32xf32>
    %126 = arith.mulf %121, %125 : vector<8x32xf32>
    %127 = arith.negf %111 : vector<8x128xf32>
    %128 = math.exp %127 : vector<8x128xf32>
    %cst_40 = arith.constant 1.000000e+00 : f32
    %129 = vector.broadcast %cst_40 : f32 to vector<8x128xf32>
    %130 = arith.addf %129, %128 : vector<8x128xf32>
    %131 = arith.divf %129, %130 : vector<8x128xf32>
    %132 = math.tanh %111 : vector<8x128xf32>
    %133 = vector.extract_strided_slice %131 {offsets = [0, 0], sizes = [8, 32], strides = [1, 1]} : vector<8x128xf32> to vector<8x32xf32>
    %134 = vector.extract_strided_slice %131 {offsets = [0, 32], sizes = [8, 32], strides = [1, 1]} : vector<8x128xf32> to vector<8x32xf32>
    %135 = vector.extract_strided_slice %132 {offsets = [0, 64], sizes = [8, 32], strides = [1, 1]} : vector<8x128xf32> to vector<8x32xf32>
    %136 = vector.extract_strided_slice %131 {offsets = [0, 96], sizes = [8, 32], strides = [1, 1]} : vector<8x128xf32> to vector<8x32xf32>
    %137 = arith.mulf %134, %76 : vector<8x32xf32>
    %138 = arith.mulf %133, %135 : vector<8x32xf32>
    %139 = arith.addf %137, %138 : vector<8x32xf32>
    %140 = math.tanh %139 : vector<8x32xf32>
    %141 = arith.mulf %136, %140 : vector<8x32xf32>
    %142 = vector.shape_cast %97 : vector<8x1xi1> to vector<8x1xi1>
    %143 = vector.broadcast %142 : vector<8x1xi1> to vector<8x32xi1>
    %144 = arith.select %143, %126, %67 : vector<8x32xi1>, vector<8x32xf32>
    %145 = vector.shape_cast %97 : vector<8x1xi1> to vector<8x1xi1>
    %146 = vector.broadcast %145 : vector<8x1xi1> to vector<8x32xi1>
    %147 = arith.select %146, %124, %70 : vector<8x32xi1>, vector<8x32xf32>
    %148 = vector.shape_cast %101 : vector<8x1xi1> to vector<8x1xi1>
    %149 = vector.broadcast %148 : vector<8x1xi1> to vector<8x32xi1>
    %150 = arith.select %149, %141, %73 : vector<8x32xi1>, vector<8x32xf32>
    %151 = vector.shape_cast %101 : vector<8x1xi1> to vector<8x1xi1>
    %152 = vector.broadcast %151 : vector<8x1xi1> to vector<8x32xi1>
    %153 = arith.select %152, %139, %76 : vector<8x32xi1>, vector<8x32xf32>
    %cst_41 = arith.constant 0.000000e+00 : f32
    %154 = vector.shape_cast %97 : vector<8x1xi1> to vector<8x1xi1>
    %155 = vector.broadcast %154 : vector<8x1xi1> to vector<8x32xi1>
    %156 = vector.broadcast %cst_41 : f32 to vector<8x32xf32>
    %157 = arith.select %155, %126, %156 : vector<8x32xi1>, vector<8x32xf32>
    %158 = arith.index_cast %90 : i32 to index
    %c0_42 = arith.constant 0 : index
    %159 = vector.load %arg13[%158, %c0_42] : memref<64x64xf32, #tpu.memory_space<vmem>>, vector<8x32xf32>
    tpu.vector_store %arg13[%158, %c0_42], %157 {strides = array<i32>} : memref<64x64xf32, #tpu.memory_space<vmem>>, vector<8x32xf32>,
    %cst_43 = arith.constant 0.000000e+00 : f32
    %160 = vector.shape_cast %101 : vector<8x1xi1> to vector<8x1xi1>
    %161 = vector.broadcast %160 : vector<8x1xi1> to vector<8x32xi1>
    %162 = vector.broadcast %cst_43 : f32 to vector<8x32xf32>
    %163 = arith.select %161, %141, %162 : vector<8x32xi1>, vector<8x32xf32>
    %164 = arith.index_cast %93 : i32 to index
    %c32_44 = arith.constant 32 : index
    %165 = vector.load %arg13[%164, %c32_44] : memref<64x64xf32, #tpu.memory_space<vmem>>, vector<8x32xf32>
    tpu.vector_store %arg13[%164, %c32_44], %163 {strides = array<i32>} : memref<64x64xf32, #tpu.memory_space<vmem>>, vector<8x32xf32>,
    %c2_i32 = arith.constant 2 : i32
    %c8_i32_45 = arith.constant 8 : i32
    %166 = arith.muli %c2_i32, %c8_i32_45 : i32
    %167 = tpu.assume_multiple %166, 8 : i32
    %c7_i32_46 = arith.constant 7 : i32
    %168 = arith.subi %c7_i32_46, %c2_i32 : i32
    %c8_i32_47 = arith.constant 8 : i32
    %169 = arith.muli %168, %c8_i32_47 : i32
    %170 = tpu.assume_multiple %169, 8 : i32
    %171 = arith.index_cast %167 : i32 to index
    %c0_48 = arith.constant 0 : index
    %172 = vector.load %arg1[%171, %c0_48] : memref<64x1xf32, #tpu.memory_space<vmem>>, vector<8x1xf32>
    %cst_49 = arith.constant 0.000000e+00 : f32
    %173 = vector.broadcast %cst_49 : f32 to vector<8x1xf32>
    %174 = arith.cmpf ogt, %172, %173 : vector<8x1xf32>
    %175 = arith.index_cast %170 : i32 to index
    %c0_50 = arith.constant 0 : index
    %176 = vector.load %arg1[%175, %c0_50] : memref<64x1xf32, #tpu.memory_space<vmem>>, vector<8x1xf32>
    %cst_51 = arith.constant 0.000000e+00 : f32
    %177 = vector.broadcast %cst_51 : f32 to vector<8x1xf32>
    %178 = arith.cmpf ogt, %176, %177 : vector<8x1xf32>
    %179 = tpu.concatenate %144, %150 in 1 : vector<8x32xf32>, vector<8x32xf32> -> vector<8x64xf32>
    %cst_52 = arith.constant dense<0.000000e+00> : vector<8x256xf32>
    %180 = tpu.matmul %179, %7, %cst_52 {dimension_numbers = #tpu.dot_dimension_numbers<[1], [0], [0], [1], [0, 0, 1, 1], [], []>} : vector<8x64xf32>, vector<64x256xf32>, vector<8x256xf32> -> vector<8x256xf32>
    %181 = arith.index_cast %167 : i32 to index
    %c0_53 = arith.constant 0 : index
    %182 = vector.load %arg12[%181, %c0_53] : memref<64x256xf32, #tpu.memory_space<vmem>>, vector<8x128xf32>
    %183 = vector.extract_strided_slice %180 {offsets = [0, 0], sizes = [8, 128], strides = [1, 1]} : vector<8x256xf32> to vector<8x128xf32>
    %184 = arith.addf %182, %183 : vector<8x128xf32>
    %185 = arith.index_cast %170 : i32 to index
    %c128_54 = arith.constant 128 : index
    %186 = vector.load %arg12[%185, %c128_54] : memref<64x256xf32, #tpu.memory_space<vmem>>, vector<8x128xf32>
    %187 = vector.extract_strided_slice %180 {offsets = [0, 128], sizes = [8, 128], strides = [1, 1]} : vector<8x256xf32> to vector<8x128xf32>
    %188 = arith.addf %186, %187 : vector<8x128xf32>
    %189 = arith.negf %184 : vector<8x128xf32>
    %190 = math.exp %189 : vector<8x128xf32>
    %cst_55 = arith.constant 1.000000e+00 : f32
    %191 = vector.broadcast %cst_55 : f32 to vector<8x128xf32>
    %192 = arith.addf %191, %190 : vector<8x128xf32>
    %193 = arith.divf %191, %192 : vector<8x128xf32>
    %194 = math.tanh %184 : vector<8x128xf32>
    %195 = vector.extract_strided_slice %193 {offsets = [0, 0], sizes = [8, 32], strides = [1, 1]} : vector<8x128xf32> to vector<8x32xf32>
    %196 = vector.extract_strided_slice %193 {offsets = [0, 32], sizes = [8, 32], strides = [1, 1]} : vector<8x128xf32> to vector<8x32xf32>
    %197 = vector.extract_strided_slice %194 {offsets = [0, 64], sizes = [8, 32], strides = [1, 1]} : vector<8x128xf32> to vector<8x32xf32>
    %198 = vector.extract_strided_slice %193 {offsets = [0, 96], sizes = [8, 32], strides = [1, 1]} : vector<8x128xf32> to vector<8x32xf32>
    %199 = arith.mulf %196, %147 : vector<8x32xf32>
    %200 = arith.mulf %195, %197 : vector<8x32xf32>
    %201 = arith.addf %199, %200 : vector<8x32xf32>
    %202 = math.tanh %201 : vector<8x32xf32>
    %203 = arith.mulf %198, %202 : vector<8x32xf32>
    %204 = arith.negf %188 : vector<8x128xf32>
    %205 = math.exp %204 : vector<8x128xf32>
    %cst_56 = arith.constant 1.000000e+00 : f32
    %206 = vector.broadcast %cst_56 : f32 to vector<8x128xf32>
    %207 = arith.addf %206, %205 : vector<8x128xf32>
    %208 = arith.divf %206, %207 : vector<8x128xf32>
    %209 = math.tanh %188 : vector<8x128xf32>
    %210 = vector.extract_strided_slice %208 {offsets = [0, 0], sizes = [8, 32], strides = [1, 1]} : vector<8x128xf32> to vector<8x32xf32>
    %211 = vector.extract_strided_slice %208 {offsets = [0, 32], sizes = [8, 32], strides = [1, 1]} : vector<8x128xf32> to vector<8x32xf32>
    %212 = vector.extract_strided_slice %209 {offsets = [0, 64], sizes = [8, 32], strides = [1, 1]} : vector<8x128xf32> to vector<8x32xf32>
    %213 = vector.extract_strided_slice %208 {offsets = [0, 96], sizes = [8, 32], strides = [1, 1]} : vector<8x128xf32> to vector<8x32xf32>
    %214 = arith.mulf %211, %153 : vector<8x32xf32>
    %215 = arith.mulf %210, %212 : vector<8x32xf32>
    %216 = arith.addf %214, %215 : vector<8x32xf32>
    %217 = math.tanh %216 : vector<8x32xf32>
    %218 = arith.mulf %213, %217 : vector<8x32xf32>
    %219 = vector.shape_cast %174 : vector<8x1xi1> to vector<8x1xi1>
    %220 = vector.broadcast %219 : vector<8x1xi1> to vector<8x32xi1>
    %221 = arith.select %220, %203, %144 : vector<8x32xi1>, vector<8x32xf32>
    %222 = vector.shape_cast %174 : vector<8x1xi1> to vector<8x1xi1>
    %223 = vector.broadcast %222 : vector<8x1xi1> to vector<8x32xi1>
    %224 = arith.select %223, %201, %147 : vector<8x32xi1>, vector<8x32xf32>
    %225 = vector.shape_cast %178 : vector<8x1xi1> to vector<8x1xi1>
    %226 = vector.broadcast %225 : vector<8x1xi1> to vector<8x32xi1>
    %227 = arith.select %226, %218, %150 : vector<8x32xi1>, vector<8x32xf32>
    %228 = vector.shape_cast %178 : vector<8x1xi1> to vector<8x1xi1>
    %229 = vector.broadcast %228 : vector<8x1xi1> to vector<8x32xi1>
    %230 = arith.select %229, %216, %153 : vector<8x32xi1>, vector<8x32xf32>
    %cst_57 = arith.constant 0.000000e+00 : f32
    %231 = vector.shape_cast %174 : vector<8x1xi1> to vector<8x1xi1>
    %232 = vector.broadcast %231 : vector<8x1xi1> to vector<8x32xi1>
    %233 = vector.broadcast %cst_57 : f32 to vector<8x32xf32>
    %234 = arith.select %232, %203, %233 : vector<8x32xi1>, vector<8x32xf32>
    %235 = arith.index_cast %167 : i32 to index
    %c0_58 = arith.constant 0 : index
    %236 = vector.load %arg13[%235, %c0_58] : memref<64x64xf32, #tpu.memory_space<vmem>>, vector<8x32xf32>
    tpu.vector_store %arg13[%235, %c0_58], %234 {strides = array<i32>} : memref<64x64xf32, #tpu.memory_space<vmem>>, vector<8x32xf32>,
    %cst_59 = arith.constant 0.000000e+00 : f32
    %237 = vector.shape_cast %178 : vector<8x1xi1> to vector<8x1xi1>
    %238 = vector.broadcast %237 : vector<8x1xi1> to vector<8x32xi1>
    %239 = vector.broadcast %cst_59 : f32 to vector<8x32xf32>
    %240 = arith.select %238, %218, %239 : vector<8x32xi1>, vector<8x32xf32>
    %241 = arith.index_cast %170 : i32 to index
    %c32_60 = arith.constant 32 : index
    %242 = vector.load %arg13[%241, %c32_60] : memref<64x64xf32, #tpu.memory_space<vmem>>, vector<8x32xf32>
    tpu.vector_store %arg13[%241, %c32_60], %240 {strides = array<i32>} : memref<64x64xf32, #tpu.memory_space<vmem>>, vector<8x32xf32>,
    %c3_i32 = arith.constant 3 : i32
    %c8_i32_61 = arith.constant 8 : i32
    %243 = arith.muli %c3_i32, %c8_i32_61 : i32
    %244 = tpu.assume_multiple %243, 8 : i32
    %c7_i32_62 = arith.constant 7 : i32
    %245 = arith.subi %c7_i32_62, %c3_i32 : i32
    %c8_i32_63 = arith.constant 8 : i32
    %246 = arith.muli %245, %c8_i32_63 : i32
    %247 = tpu.assume_multiple %246, 8 : i32
    %248 = arith.index_cast %244 : i32 to index
    %c0_64 = arith.constant 0 : index
    %249 = vector.load %arg1[%248, %c0_64] : memref<64x1xf32, #tpu.memory_space<vmem>>, vector<8x1xf32>
    %cst_65 = arith.constant 0.000000e+00 : f32
    %250 = vector.broadcast %cst_65 : f32 to vector<8x1xf32>
    %251 = arith.cmpf ogt, %249, %250 : vector<8x1xf32>
    %252 = arith.index_cast %247 : i32 to index
    %c0_66 = arith.constant 0 : index
    %253 = vector.load %arg1[%252, %c0_66] : memref<64x1xf32, #tpu.memory_space<vmem>>, vector<8x1xf32>
    %cst_67 = arith.constant 0.000000e+00 : f32
    %254 = vector.broadcast %cst_67 : f32 to vector<8x1xf32>
    %255 = arith.cmpf ogt, %253, %254 : vector<8x1xf32>
    %256 = tpu.concatenate %221, %227 in 1 : vector<8x32xf32>, vector<8x32xf32> -> vector<8x64xf32>
    %cst_68 = arith.constant dense<0.000000e+00> : vector<8x256xf32>
    %257 = tpu.matmul %256, %7, %cst_68 {dimension_numbers = #tpu.dot_dimension_numbers<[1], [0], [0], [1], [0, 0, 1, 1], [], []>} : vector<8x64xf32>, vector<64x256xf32>, vector<8x256xf32> -> vector<8x256xf32>
    %258 = arith.index_cast %244 : i32 to index
    %c0_69 = arith.constant 0 : index
    %259 = vector.load %arg12[%258, %c0_69] : memref<64x256xf32, #tpu.memory_space<vmem>>, vector<8x128xf32>
    %260 = vector.extract_strided_slice %257 {offsets = [0, 0], sizes = [8, 128], strides = [1, 1]} : vector<8x256xf32> to vector<8x128xf32>
    %261 = arith.addf %259, %260 : vector<8x128xf32>
    %262 = arith.index_cast %247 : i32 to index
    %c128_70 = arith.constant 128 : index
    %263 = vector.load %arg12[%262, %c128_70] : memref<64x256xf32, #tpu.memory_space<vmem>>, vector<8x128xf32>
    %264 = vector.extract_strided_slice %257 {offsets = [0, 128], sizes = [8, 128], strides = [1, 1]} : vector<8x256xf32> to vector<8x128xf32>
    %265 = arith.addf %263, %264 : vector<8x128xf32>
    %266 = arith.negf %261 : vector<8x128xf32>
    %267 = math.exp %266 : vector<8x128xf32>
    %cst_71 = arith.constant 1.000000e+00 : f32
    %268 = vector.broadcast %cst_71 : f32 to vector<8x128xf32>
    %269 = arith.addf %268, %267 : vector<8x128xf32>
    %270 = arith.divf %268, %269 : vector<8x128xf32>
    %271 = math.tanh %261 : vector<8x128xf32>
    %272 = vector.extract_strided_slice %270 {offsets = [0, 0], sizes = [8, 32], strides = [1, 1]} : vector<8x128xf32> to vector<8x32xf32>
    %273 = vector.extract_strided_slice %270 {offsets = [0, 32], sizes = [8, 32], strides = [1, 1]} : vector<8x128xf32> to vector<8x32xf32>
    %274 = vector.extract_strided_slice %271 {offsets = [0, 64], sizes = [8, 32], strides = [1, 1]} : vector<8x128xf32> to vector<8x32xf32>
    %275 = vector.extract_strided_slice %270 {offsets = [0, 96], sizes = [8, 32], strides = [1, 1]} : vector<8x128xf32> to vector<8x32xf32>
    %276 = arith.mulf %273, %224 : vector<8x32xf32>
    %277 = arith.mulf %272, %274 : vector<8x32xf32>
    %278 = arith.addf %276, %277 : vector<8x32xf32>
    %279 = math.tanh %278 : vector<8x32xf32>
    %280 = arith.mulf %275, %279 : vector<8x32xf32>
    %281 = arith.negf %265 : vector<8x128xf32>
    %282 = math.exp %281 : vector<8x128xf32>
    %cst_72 = arith.constant 1.000000e+00 : f32
    %283 = vector.broadcast %cst_72 : f32 to vector<8x128xf32>
    %284 = arith.addf %283, %282 : vector<8x128xf32>
    %285 = arith.divf %283, %284 : vector<8x128xf32>
    %286 = math.tanh %265 : vector<8x128xf32>
    %287 = vector.extract_strided_slice %285 {offsets = [0, 0], sizes = [8, 32], strides = [1, 1]} : vector<8x128xf32> to vector<8x32xf32>
    %288 = vector.extract_strided_slice %285 {offsets = [0, 32], sizes = [8, 32], strides = [1, 1]} : vector<8x128xf32> to vector<8x32xf32>
    %289 = vector.extract_strided_slice %286 {offsets = [0, 64], sizes = [8, 32], strides = [1, 1]} : vector<8x128xf32> to vector<8x32xf32>
    %290 = vector.extract_strided_slice %285 {offsets = [0, 96], sizes = [8, 32], strides = [1, 1]} : vector<8x128xf32> to vector<8x32xf32>
    %291 = arith.mulf %288, %230 : vector<8x32xf32>
    %292 = arith.mulf %287, %289 : vector<8x32xf32>
    %293 = arith.addf %291, %292 : vector<8x32xf32>
    %294 = math.tanh %293 : vector<8x32xf32>
    %295 = arith.mulf %290, %294 : vector<8x32xf32>
    %296 = vector.shape_cast %251 : vector<8x1xi1> to vector<8x1xi1>
    %297 = vector.broadcast %296 : vector<8x1xi1> to vector<8x32xi1>
    %298 = arith.select %297, %280, %221 : vector<8x32xi1>, vector<8x32xf32>
    %299 = vector.shape_cast %251 : vector<8x1xi1> to vector<8x1xi1>
    %300 = vector.broadcast %299 : vector<8x1xi1> to vector<8x32xi1>
    %301 = arith.select %300, %278, %224 : vector<8x32xi1>, vector<8x32xf32>
    %302 = vector.shape_cast %255 : vector<8x1xi1> to vector<8x1xi1>
    %303 = vector.broadcast %302 : vector<8x1xi1> to vector<8x32xi1>
    %304 = arith.select %303, %295, %227 : vector<8x32xi1>, vector<8x32xf32>
    %305 = vector.shape_cast %255 : vector<8x1xi1> to vector<8x1xi1>
    %306 = vector.broadcast %305 : vector<8x1xi1> to vector<8x32xi1>
    %307 = arith.select %306, %293, %230 : vector<8x32xi1>, vector<8x32xf32>
    %cst_73 = arith.constant 0.000000e+00 : f32
    %308 = vector.shape_cast %251 : vector<8x1xi1> to vector<8x1xi1>
    %309 = vector.broadcast %308 : vector<8x1xi1> to vector<8x32xi1>
    %310 = vector.broadcast %cst_73 : f32 to vector<8x32xf32>
    %311 = arith.select %309, %280, %310 : vector<8x32xi1>, vector<8x32xf32>
    %312 = arith.index_cast %244 : i32 to index
    %c0_74 = arith.constant 0 : index
    %313 = vector.load %arg13[%312, %c0_74] : memref<64x64xf32, #tpu.memory_space<vmem>>, vector<8x32xf32>
    tpu.vector_store %arg13[%312, %c0_74], %311 {strides = array<i32>} : memref<64x64xf32, #tpu.memory_space<vmem>>, vector<8x32xf32>,
    %cst_75 = arith.constant 0.000000e+00 : f32
    %314 = vector.shape_cast %255 : vector<8x1xi1> to vector<8x1xi1>
    %315 = vector.broadcast %314 : vector<8x1xi1> to vector<8x32xi1>
    %316 = vector.broadcast %cst_75 : f32 to vector<8x32xf32>
    %317 = arith.select %315, %295, %316 : vector<8x32xi1>, vector<8x32xf32>
    %318 = arith.index_cast %247 : i32 to index
    %c32_76 = arith.constant 32 : index
    %319 = vector.load %arg13[%318, %c32_76] : memref<64x64xf32, #tpu.memory_space<vmem>>, vector<8x32xf32>
    tpu.vector_store %arg13[%318, %c32_76], %317 {strides = array<i32>} : memref<64x64xf32, #tpu.memory_space<vmem>>, vector<8x32xf32>,
    %c4_i32 = arith.constant 4 : i32
    %c8_i32_77 = arith.constant 8 : i32
    %320 = arith.muli %c4_i32, %c8_i32_77 : i32
    %321 = tpu.assume_multiple %320, 8 : i32
    %c7_i32_78 = arith.constant 7 : i32
    %322 = arith.subi %c7_i32_78, %c4_i32 : i32
    %c8_i32_79 = arith.constant 8 : i32
    %323 = arith.muli %322, %c8_i32_79 : i32
    %324 = tpu.assume_multiple %323, 8 : i32
    %325 = arith.index_cast %321 : i32 to index
    %c0_80 = arith.constant 0 : index
    %326 = vector.load %arg1[%325, %c0_80] : memref<64x1xf32, #tpu.memory_space<vmem>>, vector<8x1xf32>
    %cst_81 = arith.constant 0.000000e+00 : f32
    %327 = vector.broadcast %cst_81 : f32 to vector<8x1xf32>
    %328 = arith.cmpf ogt, %326, %327 : vector<8x1xf32>
    %329 = arith.index_cast %324 : i32 to index
    %c0_82 = arith.constant 0 : index
    %330 = vector.load %arg1[%329, %c0_82] : memref<64x1xf32, #tpu.memory_space<vmem>>, vector<8x1xf32>
    %cst_83 = arith.constant 0.000000e+00 : f32
    %331 = vector.broadcast %cst_83 : f32 to vector<8x1xf32>
    %332 = arith.cmpf ogt, %330, %331 : vector<8x1xf32>
    %333 = tpu.concatenate %298, %304 in 1 : vector<8x32xf32>, vector<8x32xf32> -> vector<8x64xf32>
    %cst_84 = arith.constant dense<0.000000e+00> : vector<8x256xf32>
    %334 = tpu.matmul %333, %7, %cst_84 {dimension_numbers = #tpu.dot_dimension_numbers<[1], [0], [0], [1], [0, 0, 1, 1], [], []>} : vector<8x64xf32>, vector<64x256xf32>, vector<8x256xf32> -> vector<8x256xf32>
    %335 = arith.index_cast %321 : i32 to index
    %c0_85 = arith.constant 0 : index
    %336 = vector.load %arg12[%335, %c0_85] : memref<64x256xf32, #tpu.memory_space<vmem>>, vector<8x128xf32>
    %337 = vector.extract_strided_slice %334 {offsets = [0, 0], sizes = [8, 128], strides = [1, 1]} : vector<8x256xf32> to vector<8x128xf32>
    %338 = arith.addf %336, %337 : vector<8x128xf32>
    %339 = arith.index_cast %324 : i32 to index
    %c128_86 = arith.constant 128 : index
    %340 = vector.load %arg12[%339, %c128_86] : memref<64x256xf32, #tpu.memory_space<vmem>>, vector<8x128xf32>
    %341 = vector.extract_strided_slice %334 {offsets = [0, 128], sizes = [8, 128], strides = [1, 1]} : vector<8x256xf32> to vector<8x128xf32>
    %342 = arith.addf %340, %341 : vector<8x128xf32>
    %343 = arith.negf %338 : vector<8x128xf32>
    %344 = math.exp %343 : vector<8x128xf32>
    %cst_87 = arith.constant 1.000000e+00 : f32
    %345 = vector.broadcast %cst_87 : f32 to vector<8x128xf32>
    %346 = arith.addf %345, %344 : vector<8x128xf32>
    %347 = arith.divf %345, %346 : vector<8x128xf32>
    %348 = math.tanh %338 : vector<8x128xf32>
    %349 = vector.extract_strided_slice %347 {offsets = [0, 0], sizes = [8, 32], strides = [1, 1]} : vector<8x128xf32> to vector<8x32xf32>
    %350 = vector.extract_strided_slice %347 {offsets = [0, 32], sizes = [8, 32], strides = [1, 1]} : vector<8x128xf32> to vector<8x32xf32>
    %351 = vector.extract_strided_slice %348 {offsets = [0, 64], sizes = [8, 32], strides = [1, 1]} : vector<8x128xf32> to vector<8x32xf32>
    %352 = vector.extract_strided_slice %347 {offsets = [0, 96], sizes = [8, 32], strides = [1, 1]} : vector<8x128xf32> to vector<8x32xf32>
    %353 = arith.mulf %350, %301 : vector<8x32xf32>
    %354 = arith.mulf %349, %351 : vector<8x32xf32>
    %355 = arith.addf %353, %354 : vector<8x32xf32>
    %356 = math.tanh %355 : vector<8x32xf32>
    %357 = arith.mulf %352, %356 : vector<8x32xf32>
    %358 = arith.negf %342 : vector<8x128xf32>
    %359 = math.exp %358 : vector<8x128xf32>
    %cst_88 = arith.constant 1.000000e+00 : f32
    %360 = vector.broadcast %cst_88 : f32 to vector<8x128xf32>
    %361 = arith.addf %360, %359 : vector<8x128xf32>
    %362 = arith.divf %360, %361 : vector<8x128xf32>
    %363 = math.tanh %342 : vector<8x128xf32>
    %364 = vector.extract_strided_slice %362 {offsets = [0, 0], sizes = [8, 32], strides = [1, 1]} : vector<8x128xf32> to vector<8x32xf32>
    %365 = vector.extract_strided_slice %362 {offsets = [0, 32], sizes = [8, 32], strides = [1, 1]} : vector<8x128xf32> to vector<8x32xf32>
    %366 = vector.extract_strided_slice %363 {offsets = [0, 64], sizes = [8, 32], strides = [1, 1]} : vector<8x128xf32> to vector<8x32xf32>
    %367 = vector.extract_strided_slice %362 {offsets = [0, 96], sizes = [8, 32], strides = [1, 1]} : vector<8x128xf32> to vector<8x32xf32>
    %368 = arith.mulf %365, %307 : vector<8x32xf32>
    %369 = arith.mulf %364, %366 : vector<8x32xf32>
    %370 = arith.addf %368, %369 : vector<8x32xf32>
    %371 = math.tanh %370 : vector<8x32xf32>
    %372 = arith.mulf %367, %371 : vector<8x32xf32>
    %373 = vector.shape_cast %328 : vector<8x1xi1> to vector<8x1xi1>
    %374 = vector.broadcast %373 : vector<8x1xi1> to vector<8x32xi1>
    %375 = arith.select %374, %357, %298 : vector<8x32xi1>, vector<8x32xf32>
    %376 = vector.shape_cast %328 : vector<8x1xi1> to vector<8x1xi1>
    %377 = vector.broadcast %376 : vector<8x1xi1> to vector<8x32xi1>
    %378 = arith.select %377, %355, %301 : vector<8x32xi1>, vector<8x32xf32>
    %379 = vector.shape_cast %332 : vector<8x1xi1> to vector<8x1xi1>
    %380 = vector.broadcast %379 : vector<8x1xi1> to vector<8x32xi1>
    %381 = arith.select %380, %372, %304 : vector<8x32xi1>, vector<8x32xf32>
    %382 = vector.shape_cast %332 : vector<8x1xi1> to vector<8x1xi1>
    %383 = vector.broadcast %382 : vector<8x1xi1> to vector<8x32xi1>
    %384 = arith.select %383, %370, %307 : vector<8x32xi1>, vector<8x32xf32>
    %cst_89 = arith.constant 0.000000e+00 : f32
    %385 = vector.shape_cast %328 : vector<8x1xi1> to vector<8x1xi1>
    %386 = vector.broadcast %385 : vector<8x1xi1> to vector<8x32xi1>
    %387 = vector.broadcast %cst_89 : f32 to vector<8x32xf32>
    %388 = arith.select %386, %357, %387 : vector<8x32xi1>, vector<8x32xf32>
    %389 = arith.index_cast %321 : i32 to index
    %c0_90 = arith.constant 0 : index
    %390 = vector.load %arg13[%389, %c0_90] : memref<64x64xf32, #tpu.memory_space<vmem>>, vector<8x32xf32>
    tpu.vector_store %arg13[%389, %c0_90], %388 {strides = array<i32>} : memref<64x64xf32, #tpu.memory_space<vmem>>, vector<8x32xf32>,
    %cst_91 = arith.constant 0.000000e+00 : f32
    %391 = vector.shape_cast %332 : vector<8x1xi1> to vector<8x1xi1>
    %392 = vector.broadcast %391 : vector<8x1xi1> to vector<8x32xi1>
    %393 = vector.broadcast %cst_91 : f32 to vector<8x32xf32>
    %394 = arith.select %392, %372, %393 : vector<8x32xi1>, vector<8x32xf32>
    %395 = arith.index_cast %324 : i32 to index
    %c32_92 = arith.constant 32 : index
    %396 = vector.load %arg13[%395, %c32_92] : memref<64x64xf32, #tpu.memory_space<vmem>>, vector<8x32xf32>
    tpu.vector_store %arg13[%395, %c32_92], %394 {strides = array<i32>} : memref<64x64xf32, #tpu.memory_space<vmem>>, vector<8x32xf32>,
    %c5_i32 = arith.constant 5 : i32
    %c8_i32_93 = arith.constant 8 : i32
    %397 = arith.muli %c5_i32, %c8_i32_93 : i32
    %398 = tpu.assume_multiple %397, 8 : i32
    %c7_i32_94 = arith.constant 7 : i32
    %399 = arith.subi %c7_i32_94, %c5_i32 : i32
    %c8_i32_95 = arith.constant 8 : i32
    %400 = arith.muli %399, %c8_i32_95 : i32
    %401 = tpu.assume_multiple %400, 8 : i32
    %402 = arith.index_cast %398 : i32 to index
    %c0_96 = arith.constant 0 : index
    %403 = vector.load %arg1[%402, %c0_96] : memref<64x1xf32, #tpu.memory_space<vmem>>, vector<8x1xf32>
    %cst_97 = arith.constant 0.000000e+00 : f32
    %404 = vector.broadcast %cst_97 : f32 to vector<8x1xf32>
    %405 = arith.cmpf ogt, %403, %404 : vector<8x1xf32>
    %406 = arith.index_cast %401 : i32 to index
    %c0_98 = arith.constant 0 : index
    %407 = vector.load %arg1[%406, %c0_98] : memref<64x1xf32, #tpu.memory_space<vmem>>, vector<8x1xf32>
    %cst_99 = arith.constant 0.000000e+00 : f32
    %408 = vector.broadcast %cst_99 : f32 to vector<8x1xf32>
    %409 = arith.cmpf ogt, %407, %408 : vector<8x1xf32>
    %410 = tpu.concatenate %375, %381 in 1 : vector<8x32xf32>, vector<8x32xf32> -> vector<8x64xf32>
    %cst_100 = arith.constant dense<0.000000e+00> : vector<8x256xf32>
    %411 = tpu.matmul %410, %7, %cst_100 {dimension_numbers = #tpu.dot_dimension_numbers<[1], [0], [0], [1], [0, 0, 1, 1], [], []>} : vector<8x64xf32>, vector<64x256xf32>, vector<8x256xf32> -> vector<8x256xf32>
    %412 = arith.index_cast %398 : i32 to index
    %c0_101 = arith.constant 0 : index
    %413 = vector.load %arg12[%412, %c0_101] : memref<64x256xf32, #tpu.memory_space<vmem>>, vector<8x128xf32>
    %414 = vector.extract_strided_slice %411 {offsets = [0, 0], sizes = [8, 128], strides = [1, 1]} : vector<8x256xf32> to vector<8x128xf32>
    %415 = arith.addf %413, %414 : vector<8x128xf32>
    %416 = arith.index_cast %401 : i32 to index
    %c128_102 = arith.constant 128 : index
    %417 = vector.load %arg12[%416, %c128_102] : memref<64x256xf32, #tpu.memory_space<vmem>>, vector<8x128xf32>
    %418 = vector.extract_strided_slice %411 {offsets = [0, 128], sizes = [8, 128], strides = [1, 1]} : vector<8x256xf32> to vector<8x128xf32>
    %419 = arith.addf %417, %418 : vector<8x128xf32>
    %420 = arith.negf %415 : vector<8x128xf32>
    %421 = math.exp %420 : vector<8x128xf32>
    %cst_103 = arith.constant 1.000000e+00 : f32
    %422 = vector.broadcast %cst_103 : f32 to vector<8x128xf32>
    %423 = arith.addf %422, %421 : vector<8x128xf32>
    %424 = arith.divf %422, %423 : vector<8x128xf32>
    %425 = math.tanh %415 : vector<8x128xf32>
    %426 = vector.extract_strided_slice %424 {offsets = [0, 0], sizes = [8, 32], strides = [1, 1]} : vector<8x128xf32> to vector<8x32xf32>
    %427 = vector.extract_strided_slice %424 {offsets = [0, 32], sizes = [8, 32], strides = [1, 1]} : vector<8x128xf32> to vector<8x32xf32>
    %428 = vector.extract_strided_slice %425 {offsets = [0, 64], sizes = [8, 32], strides = [1, 1]} : vector<8x128xf32> to vector<8x32xf32>
    %429 = vector.extract_strided_slice %424 {offsets = [0, 96], sizes = [8, 32], strides = [1, 1]} : vector<8x128xf32> to vector<8x32xf32>
    %430 = arith.mulf %427, %378 : vector<8x32xf32>
    %431 = arith.mulf %426, %428 : vector<8x32xf32>
    %432 = arith.addf %430, %431 : vector<8x32xf32>
    %433 = math.tanh %432 : vector<8x32xf32>
    %434 = arith.mulf %429, %433 : vector<8x32xf32>
    %435 = arith.negf %419 : vector<8x128xf32>
    %436 = math.exp %435 : vector<8x128xf32>
    %cst_104 = arith.constant 1.000000e+00 : f32
    %437 = vector.broadcast %cst_104 : f32 to vector<8x128xf32>
    %438 = arith.addf %437, %436 : vector<8x128xf32>
    %439 = arith.divf %437, %438 : vector<8x128xf32>
    %440 = math.tanh %419 : vector<8x128xf32>
    %441 = vector.extract_strided_slice %439 {offsets = [0, 0], sizes = [8, 32], strides = [1, 1]} : vector<8x128xf32> to vector<8x32xf32>
    %442 = vector.extract_strided_slice %439 {offsets = [0, 32], sizes = [8, 32], strides = [1, 1]} : vector<8x128xf32> to vector<8x32xf32>
    %443 = vector.extract_strided_slice %440 {offsets = [0, 64], sizes = [8, 32], strides = [1, 1]} : vector<8x128xf32> to vector<8x32xf32>
    %444 = vector.extract_strided_slice %439 {offsets = [0, 96], sizes = [8, 32], strides = [1, 1]} : vector<8x128xf32> to vector<8x32xf32>
    %445 = arith.mulf %442, %384 : vector<8x32xf32>
    %446 = arith.mulf %441, %443 : vector<8x32xf32>
    %447 = arith.addf %445, %446 : vector<8x32xf32>
    %448 = math.tanh %447 : vector<8x32xf32>
    %449 = arith.mulf %444, %448 : vector<8x32xf32>
    %450 = vector.shape_cast %405 : vector<8x1xi1> to vector<8x1xi1>
    %451 = vector.broadcast %450 : vector<8x1xi1> to vector<8x32xi1>
    %452 = arith.select %451, %434, %375 : vector<8x32xi1>, vector<8x32xf32>
    %453 = vector.shape_cast %405 : vector<8x1xi1> to vector<8x1xi1>
    %454 = vector.broadcast %453 : vector<8x1xi1> to vector<8x32xi1>
    %455 = arith.select %454, %432, %378 : vector<8x32xi1>, vector<8x32xf32>
    %456 = vector.shape_cast %409 : vector<8x1xi1> to vector<8x1xi1>
    %457 = vector.broadcast %456 : vector<8x1xi1> to vector<8x32xi1>
    %458 = arith.select %457, %449, %381 : vector<8x32xi1>, vector<8x32xf32>
    %459 = vector.shape_cast %409 : vector<8x1xi1> to vector<8x1xi1>
    %460 = vector.broadcast %459 : vector<8x1xi1> to vector<8x32xi1>
    %461 = arith.select %460, %447, %384 : vector<8x32xi1>, vector<8x32xf32>
    %cst_105 = arith.constant 0.000000e+00 : f32
    %462 = vector.shape_cast %405 : vector<8x1xi1> to vector<8x1xi1>
    %463 = vector.broadcast %462 : vector<8x1xi1> to vector<8x32xi1>
    %464 = vector.broadcast %cst_105 : f32 to vector<8x32xf32>
    %465 = arith.select %463, %434, %464 : vector<8x32xi1>, vector<8x32xf32>
    %466 = arith.index_cast %398 : i32 to index
    %c0_106 = arith.constant 0 : index
    %467 = vector.load %arg13[%466, %c0_106] : memref<64x64xf32, #tpu.memory_space<vmem>>, vector<8x32xf32>
    tpu.vector_store %arg13[%466, %c0_106], %465 {strides = array<i32>} : memref<64x64xf32, #tpu.memory_space<vmem>>, vector<8x32xf32>,
    %cst_107 = arith.constant 0.000000e+00 : f32
    %468 = vector.shape_cast %409 : vector<8x1xi1> to vector<8x1xi1>
    %469 = vector.broadcast %468 : vector<8x1xi1> to vector<8x32xi1>
    %470 = vector.broadcast %cst_107 : f32 to vector<8x32xf32>
    %471 = arith.select %469, %449, %470 : vector<8x32xi1>, vector<8x32xf32>
    %472 = arith.index_cast %401 : i32 to index
    %c32_108 = arith.constant 32 : index
    %473 = vector.load %arg13[%472, %c32_108] : memref<64x64xf32, #tpu.memory_space<vmem>>, vector<8x32xf32>
    tpu.vector_store %arg13[%472, %c32_108], %471 {strides = array<i32>} : memref<64x64xf32, #tpu.memory_space<vmem>>, vector<8x32xf32>,
    %c6_i32 = arith.constant 6 : i32
    %c8_i32_109 = arith.constant 8 : i32
    %474 = arith.muli %c6_i32, %c8_i32_109 : i32
    %475 = tpu.assume_multiple %474, 8 : i32
    %c7_i32_110 = arith.constant 7 : i32
    %476 = arith.subi %c7_i32_110, %c6_i32 : i32
    %c8_i32_111 = arith.constant 8 : i32
    %477 = arith.muli %476, %c8_i32_111 : i32
    %478 = tpu.assume_multiple %477, 8 : i32
    %479 = arith.index_cast %475 : i32 to index
    %c0_112 = arith.constant 0 : index
    %480 = vector.load %arg1[%479, %c0_112] : memref<64x1xf32, #tpu.memory_space<vmem>>, vector<8x1xf32>
    %cst_113 = arith.constant 0.000000e+00 : f32
    %481 = vector.broadcast %cst_113 : f32 to vector<8x1xf32>
    %482 = arith.cmpf ogt, %480, %481 : vector<8x1xf32>
    %483 = arith.index_cast %478 : i32 to index
    %c0_114 = arith.constant 0 : index
    %484 = vector.load %arg1[%483, %c0_114] : memref<64x1xf32, #tpu.memory_space<vmem>>, vector<8x1xf32>
    %cst_115 = arith.constant 0.000000e+00 : f32
    %485 = vector.broadcast %cst_115 : f32 to vector<8x1xf32>
    %486 = arith.cmpf ogt, %484, %485 : vector<8x1xf32>
    %487 = tpu.concatenate %452, %458 in 1 : vector<8x32xf32>, vector<8x32xf32> -> vector<8x64xf32>
    %cst_116 = arith.constant dense<0.000000e+00> : vector<8x256xf32>
    %488 = tpu.matmul %487, %7, %cst_116 {dimension_numbers = #tpu.dot_dimension_numbers<[1], [0], [0], [1], [0, 0, 1, 1], [], []>} : vector<8x64xf32>, vector<64x256xf32>, vector<8x256xf32> -> vector<8x256xf32>
    %489 = arith.index_cast %475 : i32 to index
    %c0_117 = arith.constant 0 : index
    %490 = vector.load %arg12[%489, %c0_117] : memref<64x256xf32, #tpu.memory_space<vmem>>, vector<8x128xf32>
    %491 = vector.extract_strided_slice %488 {offsets = [0, 0], sizes = [8, 128], strides = [1, 1]} : vector<8x256xf32> to vector<8x128xf32>
    %492 = arith.addf %490, %491 : vector<8x128xf32>
    %493 = arith.index_cast %478 : i32 to index
    %c128_118 = arith.constant 128 : index
    %494 = vector.load %arg12[%493, %c128_118] : memref<64x256xf32, #tpu.memory_space<vmem>>, vector<8x128xf32>
    %495 = vector.extract_strided_slice %488 {offsets = [0, 128], sizes = [8, 128], strides = [1, 1]} : vector<8x256xf32> to vector<8x128xf32>
    %496 = arith.addf %494, %495 : vector<8x128xf32>
    %497 = arith.negf %492 : vector<8x128xf32>
    %498 = math.exp %497 : vector<8x128xf32>
    %cst_119 = arith.constant 1.000000e+00 : f32
    %499 = vector.broadcast %cst_119 : f32 to vector<8x128xf32>
    %500 = arith.addf %499, %498 : vector<8x128xf32>
    %501 = arith.divf %499, %500 : vector<8x128xf32>
    %502 = math.tanh %492 : vector<8x128xf32>
    %503 = vector.extract_strided_slice %501 {offsets = [0, 0], sizes = [8, 32], strides = [1, 1]} : vector<8x128xf32> to vector<8x32xf32>
    %504 = vector.extract_strided_slice %501 {offsets = [0, 32], sizes = [8, 32], strides = [1, 1]} : vector<8x128xf32> to vector<8x32xf32>
    %505 = vector.extract_strided_slice %502 {offsets = [0, 64], sizes = [8, 32], strides = [1, 1]} : vector<8x128xf32> to vector<8x32xf32>
    %506 = vector.extract_strided_slice %501 {offsets = [0, 96], sizes = [8, 32], strides = [1, 1]} : vector<8x128xf32> to vector<8x32xf32>
    %507 = arith.mulf %504, %455 : vector<8x32xf32>
    %508 = arith.mulf %503, %505 : vector<8x32xf32>
    %509 = arith.addf %507, %508 : vector<8x32xf32>
    %510 = math.tanh %509 : vector<8x32xf32>
    %511 = arith.mulf %506, %510 : vector<8x32xf32>
    %512 = arith.negf %496 : vector<8x128xf32>
    %513 = math.exp %512 : vector<8x128xf32>
    %cst_120 = arith.constant 1.000000e+00 : f32
    %514 = vector.broadcast %cst_120 : f32 to vector<8x128xf32>
    %515 = arith.addf %514, %513 : vector<8x128xf32>
    %516 = arith.divf %514, %515 : vector<8x128xf32>
    %517 = math.tanh %496 : vector<8x128xf32>
    %518 = vector.extract_strided_slice %516 {offsets = [0, 0], sizes = [8, 32], strides = [1, 1]} : vector<8x128xf32> to vector<8x32xf32>
    %519 = vector.extract_strided_slice %516 {offsets = [0, 32], sizes = [8, 32], strides = [1, 1]} : vector<8x128xf32> to vector<8x32xf32>
    %520 = vector.extract_strided_slice %517 {offsets = [0, 64], sizes = [8, 32], strides = [1, 1]} : vector<8x128xf32> to vector<8x32xf32>
    %521 = vector.extract_strided_slice %516 {offsets = [0, 96], sizes = [8, 32], strides = [1, 1]} : vector<8x128xf32> to vector<8x32xf32>
    %522 = arith.mulf %519, %461 : vector<8x32xf32>
    %523 = arith.mulf %518, %520 : vector<8x32xf32>
    %524 = arith.addf %522, %523 : vector<8x32xf32>
    %525 = math.tanh %524 : vector<8x32xf32>
    %526 = arith.mulf %521, %525 : vector<8x32xf32>
    %527 = vector.shape_cast %482 : vector<8x1xi1> to vector<8x1xi1>
    %528 = vector.broadcast %527 : vector<8x1xi1> to vector<8x32xi1>
    %529 = arith.select %528, %511, %452 : vector<8x32xi1>, vector<8x32xf32>
    %530 = vector.shape_cast %482 : vector<8x1xi1> to vector<8x1xi1>
    %531 = vector.broadcast %530 : vector<8x1xi1> to vector<8x32xi1>
    %532 = arith.select %531, %509, %455 : vector<8x32xi1>, vector<8x32xf32>
    %533 = vector.shape_cast %486 : vector<8x1xi1> to vector<8x1xi1>
    %534 = vector.broadcast %533 : vector<8x1xi1> to vector<8x32xi1>
    %535 = arith.select %534, %526, %458 : vector<8x32xi1>, vector<8x32xf32>
    %536 = vector.shape_cast %486 : vector<8x1xi1> to vector<8x1xi1>
    %537 = vector.broadcast %536 : vector<8x1xi1> to vector<8x32xi1>
    %538 = arith.select %537, %524, %461 : vector<8x32xi1>, vector<8x32xf32>
    %cst_121 = arith.constant 0.000000e+00 : f32
    %539 = vector.shape_cast %482 : vector<8x1xi1> to vector<8x1xi1>
    %540 = vector.broadcast %539 : vector<8x1xi1> to vector<8x32xi1>
    %541 = vector.broadcast %cst_121 : f32 to vector<8x32xf32>
    %542 = arith.select %540, %511, %541 : vector<8x32xi1>, vector<8x32xf32>
    %543 = arith.index_cast %475 : i32 to index
    %c0_122 = arith.constant 0 : index
    %544 = vector.load %arg13[%543, %c0_122] : memref<64x64xf32, #tpu.memory_space<vmem>>, vector<8x32xf32>
    tpu.vector_store %arg13[%543, %c0_122], %542 {strides = array<i32>} : memref<64x64xf32, #tpu.memory_space<vmem>>, vector<8x32xf32>,
    %cst_123 = arith.constant 0.000000e+00 : f32
    %545 = vector.shape_cast %486 : vector<8x1xi1> to vector<8x1xi1>
    %546 = vector.broadcast %545 : vector<8x1xi1> to vector<8x32xi1>
    %547 = vector.broadcast %cst_123 : f32 to vector<8x32xf32>
    %548 = arith.select %546, %526, %547 : vector<8x32xi1>, vector<8x32xf32>
    %549 = arith.index_cast %478 : i32 to index
    %c32_124 = arith.constant 32 : index
    %550 = vector.load %arg13[%549, %c32_124] : memref<64x64xf32, #tpu.memory_space<vmem>>, vector<8x32xf32>
    tpu.vector_store %arg13[%549, %c32_124], %548 {strides = array<i32>} : memref<64x64xf32, #tpu.memory_space<vmem>>, vector<8x32xf32>,
    %c7_i32_125 = arith.constant 7 : i32
    %c8_i32_126 = arith.constant 8 : i32
    %551 = arith.muli %c7_i32_125, %c8_i32_126 : i32
    %552 = tpu.assume_multiple %551, 8 : i32
    %c7_i32_127 = arith.constant 7 : i32
    %553 = arith.subi %c7_i32_127, %c7_i32_125 : i32
    %c8_i32_128 = arith.constant 8 : i32
    %554 = arith.muli %553, %c8_i32_128 : i32
    %555 = tpu.assume_multiple %554, 8 : i32
    %556 = arith.index_cast %552 : i32 to index
    %c0_129 = arith.constant 0 : index
    %557 = vector.load %arg1[%556, %c0_129] : memref<64x1xf32, #tpu.memory_space<vmem>>, vector<8x1xf32>
    %cst_130 = arith.constant 0.000000e+00 : f32
    %558 = vector.broadcast %cst_130 : f32 to vector<8x1xf32>
    %559 = arith.cmpf ogt, %557, %558 : vector<8x1xf32>
    %560 = arith.index_cast %555 : i32 to index
    %c0_131 = arith.constant 0 : index
    %561 = vector.load %arg1[%560, %c0_131] : memref<64x1xf32, #tpu.memory_space<vmem>>, vector<8x1xf32>
    %cst_132 = arith.constant 0.000000e+00 : f32
    %562 = vector.broadcast %cst_132 : f32 to vector<8x1xf32>
    %563 = arith.cmpf ogt, %561, %562 : vector<8x1xf32>
    %564 = tpu.concatenate %529, %535 in 1 : vector<8x32xf32>, vector<8x32xf32> -> vector<8x64xf32>
    %cst_133 = arith.constant dense<0.000000e+00> : vector<8x256xf32>
    %565 = tpu.matmul %564, %7, %cst_133 {dimension_numbers = #tpu.dot_dimension_numbers<[1], [0], [0], [1], [0, 0, 1, 1], [], []>} : vector<8x64xf32>, vector<64x256xf32>, vector<8x256xf32> -> vector<8x256xf32>
    %566 = arith.index_cast %552 : i32 to index
    %c0_134 = arith.constant 0 : index
    %567 = vector.load %arg12[%566, %c0_134] : memref<64x256xf32, #tpu.memory_space<vmem>>, vector<8x128xf32>
    %568 = vector.extract_strided_slice %565 {offsets = [0, 0], sizes = [8, 128], strides = [1, 1]} : vector<8x256xf32> to vector<8x128xf32>
    %569 = arith.addf %567, %568 : vector<8x128xf32>
    %570 = arith.index_cast %555 : i32 to index
    %c128_135 = arith.constant 128 : index
    %571 = vector.load %arg12[%570, %c128_135] : memref<64x256xf32, #tpu.memory_space<vmem>>, vector<8x128xf32>
    %572 = vector.extract_strided_slice %565 {offsets = [0, 128], sizes = [8, 128], strides = [1, 1]} : vector<8x256xf32> to vector<8x128xf32>
    %573 = arith.addf %571, %572 : vector<8x128xf32>
    %574 = arith.negf %569 : vector<8x128xf32>
    %575 = math.exp %574 : vector<8x128xf32>
    %cst_136 = arith.constant 1.000000e+00 : f32
    %576 = vector.broadcast %cst_136 : f32 to vector<8x128xf32>
    %577 = arith.addf %576, %575 : vector<8x128xf32>
    %578 = arith.divf %576, %577 : vector<8x128xf32>
    %579 = math.tanh %569 : vector<8x128xf32>
    %580 = vector.extract_strided_slice %578 {offsets = [0, 0], sizes = [8, 32], strides = [1, 1]} : vector<8x128xf32> to vector<8x32xf32>
    %581 = vector.extract_strided_slice %578 {offsets = [0, 32], sizes = [8, 32], strides = [1, 1]} : vector<8x128xf32> to vector<8x32xf32>
    %582 = vector.extract_strided_slice %579 {offsets = [0, 64], sizes = [8, 32], strides = [1, 1]} : vector<8x128xf32> to vector<8x32xf32>
    %583 = vector.extract_strided_slice %578 {offsets = [0, 96], sizes = [8, 32], strides = [1, 1]} : vector<8x128xf32> to vector<8x32xf32>
    %584 = arith.mulf %581, %532 : vector<8x32xf32>
    %585 = arith.mulf %580, %582 : vector<8x32xf32>
    %586 = arith.addf %584, %585 : vector<8x32xf32>
    %587 = math.tanh %586 : vector<8x32xf32>
    %588 = arith.mulf %583, %587 : vector<8x32xf32>
    %589 = arith.negf %573 : vector<8x128xf32>
    %590 = math.exp %589 : vector<8x128xf32>
    %cst_137 = arith.constant 1.000000e+00 : f32
    %591 = vector.broadcast %cst_137 : f32 to vector<8x128xf32>
    %592 = arith.addf %591, %590 : vector<8x128xf32>
    %593 = arith.divf %591, %592 : vector<8x128xf32>
    %594 = math.tanh %573 : vector<8x128xf32>
    %595 = vector.extract_strided_slice %593 {offsets = [0, 0], sizes = [8, 32], strides = [1, 1]} : vector<8x128xf32> to vector<8x32xf32>
    %596 = vector.extract_strided_slice %593 {offsets = [0, 32], sizes = [8, 32], strides = [1, 1]} : vector<8x128xf32> to vector<8x32xf32>
    %597 = vector.extract_strided_slice %594 {offsets = [0, 64], sizes = [8, 32], strides = [1, 1]} : vector<8x128xf32> to vector<8x32xf32>
    %598 = vector.extract_strided_slice %593 {offsets = [0, 96], sizes = [8, 32], strides = [1, 1]} : vector<8x128xf32> to vector<8x32xf32>
    %599 = arith.mulf %596, %538 : vector<8x32xf32>
    %600 = arith.mulf %595, %597 : vector<8x32xf32>
    %601 = arith.addf %599, %600 : vector<8x32xf32>
    %602 = math.tanh %601 : vector<8x32xf32>
    %603 = arith.mulf %598, %602 : vector<8x32xf32>
    %604 = vector.shape_cast %559 : vector<8x1xi1> to vector<8x1xi1>
    %605 = vector.broadcast %604 : vector<8x1xi1> to vector<8x32xi1>
    %606 = arith.select %605, %588, %529 : vector<8x32xi1>, vector<8x32xf32>
    %607 = vector.shape_cast %559 : vector<8x1xi1> to vector<8x1xi1>
    %608 = vector.broadcast %607 : vector<8x1xi1> to vector<8x32xi1>
    %609 = arith.select %608, %586, %532 : vector<8x32xi1>, vector<8x32xf32>
    %610 = vector.shape_cast %563 : vector<8x1xi1> to vector<8x1xi1>
    %611 = vector.broadcast %610 : vector<8x1xi1> to vector<8x32xi1>
    %612 = arith.select %611, %603, %535 : vector<8x32xi1>, vector<8x32xf32>
    %613 = vector.shape_cast %563 : vector<8x1xi1> to vector<8x1xi1>
    %614 = vector.broadcast %613 : vector<8x1xi1> to vector<8x32xi1>
    %615 = arith.select %614, %601, %538 : vector<8x32xi1>, vector<8x32xf32>
    %cst_138 = arith.constant 0.000000e+00 : f32
    %616 = vector.shape_cast %559 : vector<8x1xi1> to vector<8x1xi1>
    %617 = vector.broadcast %616 : vector<8x1xi1> to vector<8x32xi1>
    %618 = vector.broadcast %cst_138 : f32 to vector<8x32xf32>
    %619 = arith.select %617, %588, %618 : vector<8x32xi1>, vector<8x32xf32>
    %620 = arith.index_cast %552 : i32 to index
    %c0_139 = arith.constant 0 : index
    %621 = vector.load %arg13[%620, %c0_139] : memref<64x64xf32, #tpu.memory_space<vmem>>, vector<8x32xf32>
    tpu.vector_store %arg13[%620, %c0_139], %619 {strides = array<i32>} : memref<64x64xf32, #tpu.memory_space<vmem>>, vector<8x32xf32>,
    %cst_140 = arith.constant 0.000000e+00 : f32
    %622 = vector.shape_cast %563 : vector<8x1xi1> to vector<8x1xi1>
    %623 = vector.broadcast %622 : vector<8x1xi1> to vector<8x32xi1>
    %624 = vector.broadcast %cst_140 : f32 to vector<8x32xf32>
    %625 = arith.select %623, %603, %624 : vector<8x32xi1>, vector<8x32xf32>
    %626 = arith.index_cast %555 : i32 to index
    %c32_141 = arith.constant 32 : index
    %627 = vector.load %arg13[%626, %c32_141] : memref<64x64xf32, #tpu.memory_space<vmem>>, vector<8x32xf32>
    tpu.vector_store %arg13[%626, %c32_141], %625 {strides = array<i32>} : memref<64x64xf32, #tpu.memory_space<vmem>>, vector<8x32xf32>,
    %c8_i32_142 = arith.constant 8 : i32
    %c0_143 = arith.constant 0 : index
    %c0_144 = arith.constant 0 : index
    %628 = vector.load %arg13[%c0_143, %c0_144] : memref<64x64xf32, #tpu.memory_space<vmem>>, vector<64x64xf32>
    %c0_145 = arith.constant 0 : index
    %c0_146 = arith.constant 0 : index
    %629 = vector.load %arg9[%c0_145, %c0_146] : memref<64x128xf32, #tpu.memory_space<vmem>>, vector<64x128xf32>
    %cst_147 = arith.constant dense<0.000000e+00> : vector<64x128xf32>
    %630 = tpu.matmul %628, %629, %cst_147 {dimension_numbers = #tpu.dot_dimension_numbers<[1], [0], [0], [1], [0, 0, 1, 1], [], []>} : vector<64x64xf32>, vector<64x128xf32>, vector<64x128xf32> -> vector<64x128xf32>
    %c0_148 = arith.constant 0 : index
    %c0_149 = arith.constant 0 : index
    %631 = vector.load %arg10[%c0_148, %c0_149] : memref<1x128xf32, #tpu.memory_space<vmem>>, vector<1x128xf32>
    %632 = vector.broadcast %631 : vector<1x128xf32> to vector<64x128xf32>
    %633 = arith.addf %630, %632 : vector<64x128xf32>
    %c0_150 = arith.constant 0 : index
    %c0_151 = arith.constant 0 : index
    %634 = vector.load %arg11[%c0_150, %c0_151] : memref<64x128xf32, #tpu.memory_space<vmem>>, vector<64x128xf32>
    tpu.vector_store %arg11[%c0_150, %c0_151], %633 {strides = array<i32>} : memref<64x128xf32, #tpu.memory_space<vmem>>, vector<64x128xf32>,
    return
  }
}

</mosaic_0001>

<bundles_post_ra>
// kernel: pos_tagger_forward.1
= control target key start
LH: loop header
LB: loop body
LE: loop exit
PB: predicated region body
PF: predicated region fallthrough
CT: control target
= control target key end

     0   :  { %v2168_v3 = vmov 0.0   ;;  %s2169_s23 = smov 32   ;;  %vm66_vm0 = vcmask 261120   ;;  %vm250_vm1 = vcmask 523264   ;;  %v56_v56 = vlaneseq  ;;  %s2172_s25 = smov 96   ;;  %s3094_s7 = inlined_call_operand.vmem [shape: f32[8,32], index: 7, kind: input, shape index: {}]   ;;  %s3095_s2 = inlined_call_operand.vmem [shape: f32[32,256], index: 2, kind: input, shape index: {}]   ;;  %s3096_s4 = inlined_call_operand.vmem [shape: f32[64,256], index: 4, kind: input, shape index: {}]   ;;  %s3097_s0 = inlined_call_operand.vmem [shape: f32[64,32], index: 0, kind: input, shape index: {}]   ;;  %s3098_s5 = inlined_call_operand.vmem [shape: f32[8,32], index: 5, kind: input, shape index: {}]   ;;  %s3099_s3 = inlined_call_operand.vmem [shape: f32[1,256], index: 3, kind: input, shape index: {}]   ;;  %s3100_s8 = inlined_call_operand.vmem [shape: f32[8,32], index: 8, kind: input, shape index: {}]   ;;  %s3101_s6 = inlined_call_operand.vmem [shape: f32[8,32], index: 6, kind: input, shape index: {}]   ;;  %s3102_s1 = inlined_call_operand.vmem [shape: f32[64,1], index: 1, kind: input, shape index: {}]   ;;  %s3103_s9 = inlined_call_operand.vmem [shape: f32[64,128], index: 9, kind: input, shape index: {}]   ;;  %s3104_s10 = inlined_call_operand.vmem [shape: f32[1,128], index: 10, kind: input, shape index: {}]   ;;  %s3105_s11 = inlined_call_operand.vmem [shape: f32[64,128], index: 11, kind: output, shape index: {}]  }
   0x1   :  { %v2236_v0 = vld [vmem:[%s3094_s7] sm:$0xff]  ;;  %v47_v1 = vld [vmem:[%s3095_s2 + $0x8] sm:$0xff]  ;;  %v49_v2 = vld [vmem:[%s3095_s2 + $0x18] sm:$0xff]  ;;  %179 = vmatprep.mubr.f32.mxu1 %v2168_v3  ;;  %155 = vmatprep.mubr.f32.mxu0 %v2168_v3 }
   0x2   :  { %246 = vrot.lane.b32.xlu0 %v2236_v0, %s2169_s23  ;;  %v1877_v4 = vpack.c.bf16 %v49_v2, %v47_v1  ;;  %v46_v5 = vld [vmem:[%s3095_s2] sm:$0xff]  ;;  %v48_v6 = vld [vmem:[%s3095_s2 + $0x10] sm:$0xff]  ;;  %v51_v7 = vld [vmem:[%s3095_s2 + $0x28] sm:$0xff]  ;;  %v57_v57 = vshrl.u32 %v56_v56, 7 }
   0x3   :  { %v1879_v8 = vpack.c.bf16 %v48_v6, %v46_v5  ;;  %v53_v9 = vld [vmem:[%s3095_s2 + $0x38] sm:$0xff]  ;;  %v50_v10 = vld [vmem:[%s3095_s2 + $0x20] sm:$0xff]  ;;  %v52_v11 = vld [vmem:[%s3095_s2 + $0x30] sm:$0xff] }
   0x4   :  { %2029 = vmatprep.subr.bf16.mxu1 %v1877_v4  ;;  %v1881_v12 = vpack.c.bf16 %v53_v9, %v51_v7  ;;  %v221_v13 = vld [vmem:[%s3096_s4 + $0x8] sm:$0xff]  ;;  %v223_v14 = vld [vmem:[%s3096_s4 + $0x18] sm:$0xff]  ;;  %1878 = vmatprep.subr.bf16.mxu0 %v1877_v4  ;;  %v1883_v15 = vpack.c.bf16 %v52_v11, %v50_v10  ;;  %v220_v17 = vld [vmem:[%s3096_s4] sm:$0xff]  ;;  %v58_v58 = vsub.s32 0, %v57_v57  ;;  %v62_v60 = vsub.s32 1, %v57_v57 }
   0x5   :  { %2031 = vmatpush1.bf16.msra.mxu1 %v1879_v8  ;;  %1880 = vmatpush1.bf16.msra.mxu0 %v1879_v8  ;;  %v2272_v16 = vpack.c.bf16 %v223_v14, %v221_v13  ;;  %v222_v18 = vld [vmem:[%s3096_s4 + $0x10] sm:$0xff]  ;;  %v225_v19 = vld [vmem:[%s3096_s4 + $0x28] sm:$0xff]  ;;  %v227_v20 = vld [vmem:[%s3096_s4 + $0x38] sm:$0xff]  ;;  %v2170_v7 = vmov 0  }
   0x6   :  { %2030 = vmatprep.subr.bf16.mxu1 %v1881_v12  ;;  %1882 = vmatprep.subr.bf16.mxu0 %v1881_v12  ;;  %v42_v21 = vld [vmem:[%s3097_s0 + $0x20] sm:$0xff]  ;;  %v2289_v22 = vpack.c.bf16 %v222_v18, %v220_v17  ;;  %v2292_v23 = vpack.c.bf16 %v227_v20, %v225_v19  ;;  %v226_v25 = vld [vmem:[%s3096_s4 + $0x30] sm:$0xff]  ;;  %v229_v27 = vld [vmem:[%s3096_s4 + $0x48] sm:$0xff] }
   0x7   :  { %v224_v24 = vld [vmem:[%s3096_s4 + $0x20] sm:$0xff]  ;;  %v231_v28 = vld [vmem:[%s3096_s4 + $0x58] sm:$0xff]  ;;  %v43_v29 = vld [vmem:[%s3097_s0 + $0x28] sm:$0xff]  ;;  %2038 = vset.pattern.permute.xlu1 %v2170_v7  ;;  %2039 = vset.pattern.permute.xlu0 %v2170_v7 }
   0x8   :  { %v38_v26 = vld [vmem:[%s3097_s0] sm:$0xff]  ;;  %v2317_v30 = vpack.c.bf16 %v226_v25, %v224_v24  ;;  %v2320_v31 = vpack.c.bf16 %v231_v28, %v229_v27  ;;  %v230_v33 = vld [vmem:[%s3096_s4 + $0x50] sm:$0xff]  ;;  %v233_v34 = vld [vmem:[%s3096_s4 + $0x68] sm:$0xff] }
   0x9   :  { %2032 = vmatpush1.bf16.msra.mxu1 %v1883_v15  ;;  %1884 = vmatpush1.bf16.msra.mxu0 %v1883_v15  ;;  %v228_v32 = vld [vmem:[%s3096_s4 + $0x40] sm:$0xff]  ;;  %v235_v35 = vld [vmem:[%s3096_s4 + $0x78] sm:$0xff]  ;;  %v44_v36 = vld [vmem:[%s3097_s0 + $0x30] sm:$0xff] }
   0xa   :  { %1886 = vmatprep.subr.bf16.mxu1 %v2272_v16  ;;  %1918 = vmatprep.subr.bf16.mxu0 %v2272_v16  ;;  %v2343_v37 = vpack.c.bf16 %v230_v33, %v228_v32  ;;  %v2346_v38 = vpack.c.bf16 %v235_v35, %v233_v34  ;;  %v232_v39 = vld [vmem:[%s3096_s4 + $0x60] sm:$0xff]  ;;  %v234_v40 = vld [vmem:[%s3096_s4 + $0x70] sm:$0xff]  ;;  %v45_v41 = vld [vmem:[%s3097_s0 + $0x38] sm:$0xff] }
   0xb   :  { %v2362_v42 = vpack.c.bf16 %v234_v40, %v232_v39  ;;  %v2376_v43 = vld [vmem:[%s3098_s5] sm:$0xff]  ;;  %v1786_v20 = vld [vmem:[%s3102_s1 + $0x38] sm:$0xff] }
   0xc   :  { %1782 = vmatmul.mubr.msk.f32.vlgmr.msra.gmra.mrb[0].mxu1 %vm66_vm0, %v42_v21  ;;  %1778 = vmatmul.mubr.msk.f32.vlgmr.msra.gmra.mrb[0].mxu0 %vm66_vm0, %v38_v26  ;;  %v54_v59 = vld [vmem:[%s3099_s3] sm:$0x3]  ;;  %s2171_s3 = smov 64   ;;  %vm244_vm3 = vcmp.gt.f32.partialorder %v1786_v20, 0.0 }
   0xd   :  { %1888 = vmatpush1.bf16.msra.mxu1 %v2289_v22  ;;  %185 = vmatprep.mubr.f32.mxu1 %v2168_v3  ;;  %v2409_v61 = vrot.slane %v54_v59, %v58_v58  ;;  %v2412_v63 = vrot.slane %v54_v59, %v62_v60  ;;  %v239_v10 = vld [vmem:[%s3100_s8] sm:$0xff]  ;;  %v2439_v32 = vsel %vm244_vm3, 1, %v2170_v7 }
   0xe   :  { %1890 = vmatprep.subr.bf16.mxu1 %v2292_v23  ;;  %161 = vmatprep.mubr.f32.mxu0 %v2168_v3  ;;  %v237_v11 = vld [vmem:[%s3101_s6] sm:$0xff] }
   0xf   :  { %1920 = vmatpush1.bf16.msra.mxu0 %v2289_v22  ;;  %v240_v19 = vld [vmem:[%s3102_s1] sm:$0xff] }
  0x10   :  { %1783 = vmatmul.mubr.msk.f32.gmra.mrb[2].mxu1 %vm66_vm0, %v43_v29  ;;  %1922 = vmatprep.subr.bf16.mxu0 %v2292_v23  ;;  %vm241_vm2 = vcmp.gt.f32.partialorder %v240_v19, 0.0 }
  0x11   :  { %1892 = vmatpush1.bf16.msra.mxu1 %v2317_v30  ;;  %191 = vmatprep.mubr.f32.mxu1 %v2168_v3  ;;  %v2436_v29 = vsel %vm241_vm2, 1, %v2170_v7 }
  0x12   :  { %1894 = vmatprep.subr.bf16.mxu1 %v2320_v31 }
  0x13   :  { %1924 = vmatpush1.bf16.msra.mxu0 %v2317_v30 }
  0x14   :  { %1784 = vmatmul.mubr.msk.f32.gmra.mrb[4].mxu1 %vm66_vm0, %v44_v36  ;;  %1926 = vmatprep.subr.bf16.mxu0 %v2320_v31 }
  0x15   :  { %1896 = vmatpush1.bf16.msra.mxu1 %v2343_v37  ;;  %197 = vmatprep.mubr.f32.mxu1 %v2168_v3 }
  0x16   :  { %1898 = vmatprep.subr.bf16.mxu1 %v2346_v38 }
  0x17   :  { %1928 = vmatpush1.bf16.msra.mxu0 %v2343_v37 }
  0x18   :  { %1785 = vmatmul.mubr.msk.f32.gmra.mrb[6].mxu1 %vm66_vm0, %v45_v41  ;;  %1930 = vmatprep.subr.bf16.mxu0 %v2346_v38 }
  0x19   :  { %1900 = vmatpush1.bf16.msra.mxu1 %v2362_v42  ;;  %318 = vmatprep.mubr.f32.mxu1 %v2168_v3 }
  0x1a   :  { %1902 = vmatprep.subr.bf16.mxu1 %v2272_v16 }
  0x1b   :  { %1932 = vmatpush1.bf16.msra.mxu0 %v2362_v42 }
  0x1c   :  { %1950 = vmatprep.subr.bf16.mxu0 %v2272_v16 }
  0x74   :  { %v247_v44 = vpop.permute.xlu0 %246 }
  0x75   :  { %v249_v45 = vsel %vm66_vm0, %v2376_v43, %v247_v44 }
  0x76   :  { %1787 = vmatmul.mubr.msk.f32.vlgmr.msra.gmra.mrb[8].mxu1 %vm250_vm1, %v249_v45 }
  0x77   :  { %1904 = vmatpush1.bf16.msra.mxu1 %v2289_v22  ;;  %508 = vmatprep.mubr.f32.mxu1 %v2168_v3 }
  0x78   :  { %1906 = vmatprep.subr.bf16.mxu1 %v2292_v23 }
  0x7b   :  { %1908 = vmatpush1.bf16.msra.mxu1 %v2317_v30 }
  0x7c   :  { %1910 = vmatprep.subr.bf16.mxu1 %v2320_v31 }
  0x7f   :  { %1912 = vmatpush1.bf16.msra.mxu1 %v2343_v37 }
  0x80   :  { %1914 = vmatprep.subr.bf16.mxu1 %v2346_v38 }
  0x83   :  { %1916 = vmatpush1.bf16.msra.mxu1 %v2362_v42 }
  0x84   :  { %1934 = vmatprep.subr.bf16.mxu1 %v2272_v16 }
  0xdf   :  { %v2390_v46 = vpop.f32.mrb[0].mxu1  ;;  %v157_v47 = vpop.f32.mrb[0].mxu0 }
  0xe0   :  { %v2392_v48 = vpop.f32.mrb[1].mxu1  ;;  %v2394_v49 = vpop.f32.mrb[1].mxu0  ;;  %v158_v62 = vadd.f32 %v157_v47, %v2409_v61  ;;  %v39_v47 = vld [vmem:[%s3097_s0 + $0x8] sm:$0xff] }
  0xe1   :  { %1779 = vmatmul.mubr.msk.f32.gmra.mrb[2].mxu0 %vm66_vm0, %v39_v47 }
  0xe2   :  { %167 = vmatprep.mubr.f32.mxu0 %v2168_v3 }
  0xe3   :  { %v2396_v50 = vpop.f32.mrb[2].mxu1 }
  0xe4   :  { %v2398_v51 = vpop.f32.mrb[3].mxu1 }
  0xe7   :  { %v2400_v52 = vpop.f32.mrb[4].mxu1 }
  0xe8   :  { %v2402_v53 = vpop.f32.mrb[5].mxu1 }
  0xeb   :  { %v2404_v54 = vpop.f32.mrb[6].mxu1 }
  0xec   :  { %v201_v55 = vpop.f32.mrb[7].mxu1 }
  0xed   :  { %v202_v1 = vadd.f32 %v201_v55, %v2412_v63 }
 0x149   :  { %v320_v2 = vpop.f32.mrb[8].mxu1 }
 0x14a   :  { %v329_v4 = vadd.f32 %v320_v2, %v158_v62  ;;  %v322_v5 = vpop.f32.mrb[9].mxu1 }
 0x14b   :  { %v334_v6 = vadd.f32 %v322_v5, %v202_v1 }
 0x14c   :  { %2040 = vtanh.f32 %v329_v4  ;;  %v1788_v12 = vmul.f32 -1.442695, %v329_v4 }
 0x14d   :  { %2042 = vtanh.f32 %v334_v6  ;;  %v1789_v13 = vmul.f32 -1.442695, %v334_v6 }
 0x14e   :  { %2044 = vpow2.f32 %v1788_v12 }
 0x14f   :  { %2046 = vpow2.f32 %v1789_v13 }
 0x156   :  { %v2041_v8 = vpop.eup %2040 }
 0x157   :  { %v2043_v9 = vpop.eup %2042  ;;  %348 = vrot.lane.b32.xlu0 %v2041_v8, %s2171_s3 }
 0x158   :  { %376 = vrot.lane.b32.xlu1 %v2043_v9, %s2171_s3  ;;  %v2045_v14 = vpop.eup %2044 }
 0x159   :  { %v2047_v15 = vpop.eup %2046  ;;  %v338_v17 = vadd.f32 1.0, %v2045_v14 }
 0x15a   :  { %v366_v18 = vadd.f32 1.0, %v2047_v15 }
 0x15b   :  { %371 = vrot.lane.b32.xlu0 %v239_v10, %s2169_s23  ;;  %2048 = vrcp.f32 %v338_v17 }
 0x15c   :  { %343 = vrot.lane.b32.xlu1 %v237_v11, %s2169_s23  ;;  %2050 = vrcp.f32 %v366_v18  ;;  %v196_v11 = vadd.f32 %v2402_v53, %v2412_v63 }
 0x165   :  { %v2049_v21 = vpop.eup %2048 }
 0x166   :  { %v2051_v25 = vpop.eup %2050 }
 0x1b4   :  { %v163_v8 = vpop.f32.mrb[2].mxu0 }
 0x1b5   :  { %v2499_v9 = vpop.f32.mrb[3].mxu0  ;;  %v164_v10 = vadd.f32 %v163_v8, %v2409_v61 }
 0x1c9   :  { %v349_v24 = vpop.permute.xlu0 %348 }
 0x1ca   :  { %v351_v26 = vmul.f32 %v2049_v21, %v349_v24  ;;  %v377_v27 = vpop.permute.xlu1 %376 }
 0x1cb   :  { %v379_v28 = vmul.f32 %v2051_v25, %v377_v27  ;;  %v1791_v27 = vld [vmem:[%s3102_s1 + $0x30] sm:$0xff] }
 0x1cc   :  { %353 = vrot.lane.b32.xlu1 %v351_v26, %s2169_s23  ;;  %v1790_v26 = vld [vmem:[%s3102_s1 + $0x8] sm:$0xff]  ;;  %vm431_vm7 = vcmp.gt.f32.partialorder %v1791_v27, 0.0 }
 0x1cd   :  { %381 = vrot.lane.b32.xlu0 %v379_v28, %s2169_s23  ;;  %v2446_v34 = vpop.permute.xlu0 %371  ;;  %vm428_vm6 = vcmp.gt.f32.partialorder %v1790_v26, 0.0  ;;  %v2518_v47 = vsel %vm431_vm7, 1, %v2170_v7  ;;  %v190_v26 = vadd.f32 %v2398_v51, %v2412_v63 }
 0x1ce   :  { %v2444_v33 = vpop.permute.xlu1 %343  ;;  %v374_v39 = vmul.f32 %v2051_v25, %v2446_v34 }
 0x1cf   :  { %v346_v35 = vmul.f32 %v2049_v21, %v2444_v33 }
 0x1d0   :  { %393 = vperm.xlu1 %2038, %v2436_v29  }
 0x1d1   :  { %404 = vperm.xlu0 %2039, %v2439_v32  }
 0x1d5   :  { %397 = vrot.lane.b32.xlu0 %v2376_v43, %s2172_s25 }
 0x23e   :  { %v354_v36 = vpop.permute.xlu1 %353 }
 0x23f   :  { %v2450_v40 = vadd.f32 %v354_v36, %v346_v35  ;;  %v382_v41 = vpop.permute.xlu0 %381 }
 0x240   :  { %v2453_v44 = vadd.f32 %v382_v41, %v374_v39 }
 0x241   :  { %2052 = vtanh.f32 %v2450_v40 }
 0x242   :  { %2054 = vtanh.f32 %v2453_v44 }
 0x24b   :  { %v2053_v45 = vpop.eup %2052 }
 0x24c   :  { %359 = vrot.lane.b32.xlu1 %v2053_v45, %s2171_s3  ;;  %v2055_v43 = vpop.eup %2054 }
 0x24f   :  { %v2464_v55 = vpop.permute.xlu1 %393 }
 0x250   :  { %387 = vrot.lane.b32.xlu1 %v2055_v43, %s2171_s3  ;;  %v2466_v56 = vpop.permute.xlu0 %404  ;;  %vm395_vm4 = vcmp.eq.s32.totalorder %v2464_v55, 1  ;;  %v2515_v43 = vsel %vm428_vm6, 1, %v2170_v7 }
 0x251   :  { %vm406_vm5 = vcmp.eq.s32.totalorder %v2466_v56, 1  ;;  %v1622_v56 = vld [vmem:[%s3103_s9 + $0x38] sm:$0xff] }
 0x254   :  { %407 = vrot.lane.b32.xlu1 %v2236_v0, %s2172_s25  ;;  %v398_v58 = vpop.permute.xlu0 %397 }
 0x2be   :  { %v360_v57 = vpop.permute.xlu1 %359 }
 0x2bf   :  { %v2468_v59 = vmul.f32 %v2049_v21, %v360_v57  ;;  %v2526_v57 = vsel %vm395_vm4, %v2450_v40, %v2444_v33  ;;  %v40_v33 = vld [vmem:[%s3097_s0 + $0x10] sm:$0xff] }
 0x2c0   :  { %1780 = vmatmul.mubr.msk.f32.gmra.mrb[4].mxu0 %vm66_vm0, %v40_v33  ;;  %v1795_v33 = vld [vmem:[%s3102_s1 + $0x10] sm:$0xff] }
 0x2c1   :  { %v2474_v0 = vsel %vm395_vm4, %v2468_v59, %v398_v58  ;;  %v2532_v58 = vsel %vm406_vm5, %v2453_v44, %v2446_v34  ;;  %173 = vmatprep.mubr.f32.mxu0 %v2168_v3  ;;  %v41_v34 = vld [vmem:[%s3097_s0 + $0x18] sm:$0xff]  ;;  %vm603_vm10 = vcmp.gt.f32.partialorder %v1795_v33, 0.0 }
 0x2c2   :  { %433 = vrot.lane.b32.xlu0 %v2474_v0, %s2169_s23  ;;  %v388_v60 = vpop.permute.xlu1 %387 }
 0x2c3   :  { %v2478_v62 = vmul.f32 %v2051_v25, %v388_v60 }
 0x2c4   :  { %1781 = vmatmul.mubr.msk.f32.gmra.mrb[6].mxu0 %vm66_vm0, %v41_v34  ;;  %v1796_v34 = vld [vmem:[%s3102_s1 + $0x28] sm:$0xff] }
 0x2c5   :  { %683 = vmatprep.mubr.f32.mxu0 %v2168_v3  ;;  %vm606_vm11 = vcmp.gt.f32.partialorder %v1796_v34, 0.0 }
 0x2c6   :  { %v408_v1 = vpop.permute.xlu1 %407 }
 0x2c7   :  { %v2484_v2 = vsel %vm406_vm5, %v2478_v62, %v408_v1 }
 0x2c8   :  { %437 = vrot.lane.b32.xlu1 %v2484_v2, %s2171_s3 }
 0x334   :  { %v434_v4 = vpop.permute.xlu0 %433 }
 0x33a   :  { %v438_v5 = vpop.permute.xlu1 %437 }
 0x33b   :  { %v440_v6 = vsel %vm66_vm0, %v434_v4, %v438_v5 }
 0x33c   :  { %1792 = vmatmul.mubr.msk.f32.vlgmr.msra.gmra.mrb[10].mxu1 %vm250_vm1, %v440_v6 }
 0x33d   :  { %1936 = vmatpush1.bf16.msra.mxu1 %v2289_v22  ;;  %858 = vmatprep.mubr.f32.mxu1 %v2168_v3 }
 0x33e   :  { %1938 = vmatprep.subr.bf16.mxu1 %v2292_v23 }
 0x341   :  { %1940 = vmatpush1.bf16.msra.mxu1 %v2317_v30 }
 0x342   :  { %1942 = vmatprep.subr.bf16.mxu1 %v2320_v31 }
 0x345   :  { %1944 = vmatpush1.bf16.msra.mxu1 %v2343_v37 }
 0x346   :  { %1946 = vmatprep.subr.bf16.mxu1 %v2346_v38 }
 0x349   :  { %1948 = vmatpush1.bf16.msra.mxu1 %v2362_v42 }
 0x34a   :  { %1966 = vmatprep.subr.bf16.mxu1 %v2272_v16 }
 0x40f   :  { %v510_v12 = vpop.f32.mrb[10].mxu1 }
 0x410   :  { %v519_v13 = vadd.f32 %v510_v12, %v164_v10  ;;  %v512_v14 = vpop.f32.mrb[11].mxu1 }
 0x411   :  { %v524_v15 = vadd.f32 %v512_v14, %v196_v11 }
 0x412   :  { %2056 = vtanh.f32 %v519_v13  ;;  %v1793_v19 = vmul.f32 -1.442695, %v519_v13 }
 0x413   :  { %2058 = vtanh.f32 %v524_v15  ;;  %v1794_v20 = vmul.f32 -1.442695, %v524_v15 }
 0x414   :  { %2060 = vpow2.f32 %v1793_v19  ;;  %v169_v19 = vpop.f32.mrb[4].mxu0 }
 0x415   :  { %2062 = vpow2.f32 %v1794_v20  ;;  %v2580_v20 = vpop.f32.mrb[5].mxu0 }
 0x41c   :  { %v2057_v17 = vpop.eup %2056 }
 0x41d   :  { %v2059_v18 = vpop.eup %2058  ;;  %534 = vrot.lane.b32.xlu0 %v2057_v17, %s2171_s3 }
 0x41e   :  { %558 = vrot.lane.b32.xlu1 %v2059_v18, %s2171_s3  ;;  %v2061_v21 = vpop.eup %2060 }
 0x41f   :  { %v2063_v24 = vpop.eup %2062  ;;  %v528_v25 = vadd.f32 1.0, %v2061_v21  ;;  %v2582_v21 = vpop.f32.mrb[6].mxu0 }
 0x420   :  { %v552_v53 = vadd.f32 1.0, %v2063_v24  ;;  %v2584_v24 = vpop.f32.mrb[7].mxu0 }
 0x421   :  { %2064 = vrcp.f32 %v528_v25 }
 0x422   :  { %2066 = vrcp.f32 %v552_v53 }
 0x42b   :  { %v2065_v28 = vpop.eup %2064 }
 0x42c   :  { %v2067_v36 = vpop.eup %2066  ;;  %v532_v60 = vmul.f32 %v2065_v28, %v2526_v57 }
 0x42d   :  { %v556_v4 = vmul.f32 %v2067_v36, %v2532_v58 }
 0x48f   :  { %v535_v35 = vpop.permute.xlu0 %534 }
 0x490   :  { %v537_v39 = vmul.f32 %v2065_v28, %v535_v35  ;;  %v559_v41 = vpop.permute.xlu1 %558 }
 0x491   :  { %v561_v45 = vmul.f32 %v2067_v36, %v559_v41 }
 0x492   :  { %539 = vrot.lane.b32.xlu0 %v537_v39, %s2169_s23 }
 0x493   :  { %563 = vrot.lane.b32.xlu1 %v561_v45, %s2169_s23 }
 0x496   :  { %575 = vperm.xlu0 %2039, %v2515_v43  }
 0x497   :  { %582 = vperm.xlu1 %2038, %v2518_v47  }
 0x504   :  { %v540_v1 = vpop.permute.xlu0 %539 }
 0x505   :  { %v2536_v5 = vadd.f32 %v540_v1, %v532_v60  ;;  %v564_v6 = vpop.permute.xlu1 %563 }
 0x506   :  { %v2538_v8 = vadd.f32 %v564_v6, %v556_v4 }
 0x507   :  { %2068 = vtanh.f32 %v2536_v5 }
 0x508   :  { %2070 = vtanh.f32 %v2538_v8 }
 0x511   :  { %v2069_v40 = vpop.eup %2068 }
 0x512   :  { %v2071_v44 = vpop.eup %2070  ;;  %545 = vrot.lane.b32.xlu0 %v2069_v40, %s2171_s3 }
 0x513   :  { %569 = vrot.lane.b32.xlu1 %v2071_v44, %s2171_s3 }
 0x515   :  { %v2554_v10 = vpop.permute.xlu0 %575 }
 0x516   :  { %v2556_v11 = vpop.permute.xlu1 %582  ;;  %vm577_vm8 = vcmp.eq.s32.totalorder %v2554_v10, 1 }
 0x517   :  { %vm584_vm9 = vcmp.eq.s32.totalorder %v2556_v11, 1 }
 0x584   :  { %v546_v12 = vpop.permute.xlu0 %545 }
 0x585   :  { %v2558_v13 = vmul.f32 %v2065_v28, %v546_v12  ;;  %v570_v14 = vpop.permute.xlu1 %569 }
 0x586   :  { %v2561_v15 = vmul.f32 %v2067_v36, %v570_v14 }
 0x587   :  { %v2568_v17 = vsel %vm577_vm8, %v2558_v13, %v2474_v0 }
 0x588   :  { %608 = vrot.lane.b32.xlu0 %v2568_v17, %s2169_s23  ;;  %v2576_v18 = vsel %vm584_vm9, %v2561_v15, %v2484_v2  ;;  %v170_v2 = vadd.f32 %v169_v19, %v2409_v61 }
 0x589   :  { %612 = vrot.lane.b32.xlu1 %v2576_v18, %s2171_s3 }
 0x5fa   :  { %v609_v0 = vpop.permute.xlu0 %608 }
 0x5fb   :  { %v613_v25 = vpop.permute.xlu1 %612 }
 0x5fc   :  { %v615_v53 = vsel %vm66_vm0, %v609_v0, %v613_v25  ;;  %v2611_v25 = vsel %vm603_vm10, 1, %v2170_v7 }
 0x5fd   :  { %1797 = vmatmul.mubr.msk.f32.vlgmr.msra.gmra.mrb[8].mxu0 %vm250_vm1, %v615_v53  ;;  %v2614_v53 = vsel %vm606_vm11, 1, %v2170_v7 }
 0x5fe   :  { %1952 = vmatpush1.bf16.msra.mxu0 %v2289_v22  ;;  %1031 = vmatprep.mubr.f32.mxu0 %v2168_v3 }
 0x5ff   :  { %1954 = vmatprep.subr.bf16.mxu0 %v2292_v23 }
 0x602   :  { %1956 = vmatpush1.bf16.msra.mxu0 %v2317_v30 }
 0x603   :  { %1958 = vmatprep.subr.bf16.mxu0 %v2320_v31 }
 0x606   :  { %1960 = vmatpush1.bf16.msra.mxu0 %v2343_v37 }
 0x607   :  { %1962 = vmatprep.subr.bf16.mxu0 %v2346_v38 }
 0x60a   :  { %1964 = vmatpush1.bf16.msra.mxu0 %v2362_v42 }
 0x60b   :  { %1982 = vmatprep.subr.bf16.mxu0 %v2272_v16 }
 0x6d0   :  { %v685_v27 = vpop.f32.mrb[8].mxu0 }
 0x6d1   :  { %v694_v28 = vadd.f32 %v685_v27, %v170_v2  ;;  %v687_v35 = vpop.f32.mrb[9].mxu0  ;;  %v2622_v2 = vsel %vm577_vm8, %v2536_v5, %v2526_v57 }
 0x6d2   :  { %v699_v36 = vadd.f32 %v687_v35, %v190_v26  ;;  %v2628_v26 = vsel %vm584_vm9, %v2538_v8, %v2532_v58 }
 0x6d3   :  { %2072 = vtanh.f32 %v694_v28  ;;  %v1798_v45 = vmul.f32 -1.442695, %v694_v28 }
 0x6d4   :  { %2074 = vtanh.f32 %v699_v36  ;;  %v1799_v60 = vmul.f32 -1.442695, %v699_v36 }
 0x6d5   :  { %2076 = vpow2.f32 %v1798_v45 }
 0x6d6   :  { %2078 = vpow2.f32 %v1799_v60 }
 0x6dd   :  { %v2073_v39 = vpop.eup %2072 }
 0x6de   :  { %v2075_v41 = vpop.eup %2074  ;;  %709 = vrot.lane.b32.xlu0 %v2073_v39, %s2171_s3 }
 0x6df   :  { %733 = vrot.lane.b32.xlu1 %v2075_v41, %s2171_s3  ;;  %v2077_v1 = vpop.eup %2076 }
 0x6e0   :  { %v2079_v4 = vpop.eup %2078  ;;  %v703_v6 = vadd.f32 1.0, %v2077_v1 }
 0x6e1   :  { %v727_v51 = vadd.f32 1.0, %v2079_v4 }
 0x6e2   :  { %2080 = vrcp.f32 %v703_v6 }
 0x6e3   :  { %2082 = vrcp.f32 %v727_v51 }
 0x6ec   :  { %v2081_v40 = vpop.eup %2080 }
 0x6ed   :  { %v2083_v12 = vpop.eup %2082  ;;  %v707_v27 = vmul.f32 %v2081_v40, %v2622_v2 }
 0x6ee   :  { %v731_v35 = vmul.f32 %v2083_v12, %v2628_v26 }
 0x750   :  { %v710_v44 = vpop.permute.xlu0 %709 }
 0x751   :  { %v712_v14 = vmul.f32 %v2081_v40, %v710_v44  ;;  %v734_v19 = vpop.permute.xlu1 %733 }
 0x752   :  { %v736_v0 = vmul.f32 %v2083_v12, %v734_v19 }
 0x753   :  { %714 = vrot.lane.b32.xlu0 %v712_v14, %s2169_s23 }
 0x754   :  { %738 = vrot.lane.b32.xlu1 %v736_v0, %s2169_s23 }
 0x757   :  { %750 = vperm.xlu0 %2039, %v2611_v25  }
 0x758   :  { %757 = vperm.xlu1 %2038, %v2614_v53  }
 0x7c5   :  { %v715_v28 = vpop.permute.xlu0 %714 }
 0x7c6   :  { %v2632_v36 = vadd.f32 %v715_v28, %v707_v27  ;;  %v739_v39 = vpop.permute.xlu1 %738 }
 0x7c7   :  { %v2634_v41 = vadd.f32 %v739_v39, %v731_v35 }
 0x7c8   :  { %2084 = vtanh.f32 %v2632_v36 }
 0x7c9   :  { %2086 = vtanh.f32 %v2634_v41 }
 0x7d2   :  { %v2085_v57 = vpop.eup %2084 }
 0x7d3   :  { %v2087_v5 = vpop.eup %2086  ;;  %720 = vrot.lane.b32.xlu0 %v2085_v57, %s2171_s3  ;;  %v1800_v57 = vld [vmem:[%s3102_s1 + $0x18] sm:$0xff] }
 0x7d4   :  { %744 = vrot.lane.b32.xlu1 %v2087_v5, %s2171_s3  ;;  %v1801_v5 = vld [vmem:[%s3102_s1 + $0x20] sm:$0xff]  ;;  %vm778_vm14 = vcmp.gt.f32.partialorder %v1800_v57, 0.0 }
 0x7d5   :  { %vm781_vm15 = vcmp.gt.f32.partialorder %v1801_v5, 0.0 }
 0x7d6   :  { %v2640_v58 = vpop.permute.xlu0 %750 }
 0x7d7   :  { %v2642_v8 = vpop.permute.xlu1 %757  ;;  %vm752_vm12 = vcmp.eq.s32.totalorder %v2640_v58, 1 }
 0x7d8   :  { %vm759_vm13 = vcmp.eq.s32.totalorder %v2642_v8, 1  ;;  %v1619_v8 = vld [vmem:[%s3103_s9 + $0x20] sm:$0xff] }
 0x845   :  { %v721_v45 = vpop.permute.xlu0 %720 }
 0x846   :  { %v2644_v60 = vmul.f32 %v2081_v40, %v721_v45  ;;  %v745_v1 = vpop.permute.xlu1 %744 }
 0x847   :  { %v2647_v4 = vmul.f32 %v2083_v12, %v745_v1 }
 0x848   :  { %v2654_v6 = vsel %vm752_vm12, %v2644_v60, %v2568_v17  ;;  %v176_v17 = vadd.f32 %v2582_v21, %v2409_v61 }
 0x849   :  { %783 = vrot.lane.b32.xlu0 %v2654_v6, %s2169_s23  ;;  %v2662_v51 = vsel %vm759_vm13, %v2647_v4, %v2576_v18  ;;  %v184_v18 = vadd.f32 %v2392_v48, %v2412_v63 }
 0x84a   :  { %787 = vrot.lane.b32.xlu1 %v2662_v51, %s2171_s3 }
 0x8bb   :  { %v784_v33 = vpop.permute.xlu0 %783 }
 0x8bc   :  { %v788_v34 = vpop.permute.xlu1 %787 }
 0x8bd   :  { %v790_v40 = vsel %vm66_vm0, %v784_v33, %v788_v34 }
 0x8be   :  { %1802 = vmatmul.mubr.msk.f32.vlgmr.msra.gmra.mrb[12].mxu1 %vm250_vm1, %v790_v40 }
 0x8bf   :  { %1968 = vmatpush1.bf16.msra.mxu1 %v2289_v22  ;;  %1196 = vmatprep.mubr.f32.mxu1 %v2168_v3 }
 0x8c0   :  { %1970 = vmatprep.subr.bf16.mxu1 %v2292_v23 }
 0x8c3   :  { %1972 = vmatpush1.bf16.msra.mxu1 %v2317_v30 }
 0x8c4   :  { %1974 = vmatprep.subr.bf16.mxu1 %v2320_v31 }
 0x8c7   :  { %1976 = vmatpush1.bf16.msra.mxu1 %v2343_v37 }
 0x8c8   :  { %1978 = vmatprep.subr.bf16.mxu1 %v2346_v38 }
 0x8cb   :  { %1980 = vmatpush1.bf16.msra.mxu1 %v2362_v42 }
 0x8cc   :  { %1998 = vmatprep.subr.bf16.mxu1 %v2272_v16 }
 0x991   :  { %v860_v44 = vpop.f32.mrb[12].mxu1 }
 0x992   :  { %v869_v12 = vadd.f32 %v860_v44, %v176_v17  ;;  %v862_v14 = vpop.f32.mrb[13].mxu1  ;;  %v2695_v44 = vsel %vm781_vm15, 1, %v2170_v7 }
 0x993   :  { %v874_v19 = vadd.f32 %v862_v14, %v184_v18  ;;  %v2692_v18 = vsel %vm778_vm14, 1, %v2170_v7  ;;  %v2709_v14 = vsel %vm759_vm13, %v2634_v41, %v2628_v26 }
 0x994   :  { %2088 = vtanh.f32 %v869_v12  ;;  %v1803_v28 = vmul.f32 -1.442695, %v869_v12  ;;  %v2703_v12 = vsel %vm752_vm12, %v2632_v36, %v2622_v2 }
 0x995   :  { %2090 = vtanh.f32 %v874_v19  ;;  %v1804_v16 = vmul.f32 -1.442695, %v874_v19 }
 0x996   :  { %2092 = vpow2.f32 %v1803_v28 }
 0x997   :  { %2094 = vpow2.f32 %v1804_v16 }
 0x99e   :  { %v2089_v0 = vpop.eup %2088 }
 0x99f   :  { %v2091_v27 = vpop.eup %2090  ;;  %884 = vrot.lane.b32.xlu0 %v2089_v0, %s2171_s3 }
 0x9a0   :  { %908 = vrot.lane.b32.xlu1 %v2091_v27, %s2171_s3  ;;  %v2093_v21 = vpop.eup %2092 }
 0x9a1   :  { %v2095_v35 = vpop.eup %2094  ;;  %v878_v39 = vadd.f32 1.0, %v2093_v21 }
 0x9a2   :  { %v902_v48 = vadd.f32 1.0, %v2095_v35 }
 0x9a3   :  { %2096 = vrcp.f32 %v878_v39 }
 0x9a4   :  { %2098 = vrcp.f32 %v902_v48 }
 0x9ad   :  { %v2097_v45 = vpop.eup %2096 }
 0x9ae   :  { %v2099_v33 = vpop.eup %2098  ;;  %v882_v19 = vmul.f32 %v2097_v45, %v2703_v12 }
 0x9af   :  { %v906_v0 = vmul.f32 %v2099_v33, %v2709_v14 }
 0xa11   :  { %v885_v1 = vpop.permute.xlu0 %884 }
 0xa12   :  { %v887_v34 = vmul.f32 %v2097_v45, %v885_v1  ;;  %v909_v40 = vpop.permute.xlu1 %908 }
 0xa13   :  { %v911_v17 = vmul.f32 %v2099_v33, %v909_v40 }
 0xa14   :  { %889 = vrot.lane.b32.xlu0 %v887_v34, %s2169_s23 }
 0xa15   :  { %913 = vrot.lane.b32.xlu1 %v911_v17, %s2169_s23 }
 0xa18   :  { %925 = vperm.xlu0 %2039, %v2692_v18  }
 0xa19   :  { %932 = vperm.xlu1 %2038, %v2695_v44  }
 0xa86   :  { %v890_v7 = vpop.permute.xlu0 %889 }
 0xa87   :  { %v2713_v27 = vadd.f32 %v890_v7, %v882_v19  ;;  %v914_v28 = vpop.permute.xlu1 %913 }
 0xa88   :  { %v2715_v16 = vadd.f32 %v914_v28, %v906_v0 }
 0xa89   :  { %2100 = vtanh.f32 %v2713_v27 }
 0xa8a   :  { %2102 = vtanh.f32 %v2715_v16 }
 0xa93   :  { %v2101_v2 = vpop.eup %2100 }
 0xa94   :  { %v2103_v36 = vpop.eup %2102  ;;  %895 = vrot.lane.b32.xlu0 %v2101_v2, %s2171_s3 }
 0xa95   :  { %919 = vrot.lane.b32.xlu1 %v2103_v36, %s2171_s3 }
 0xa97   :  { %v2721_v26 = vpop.permute.xlu0 %925 }
 0xa98   :  { %v2723_v41 = vpop.permute.xlu1 %932  ;;  %vm927_vm2 = vcmp.eq.s32.totalorder %v2721_v26, 1  ;;  %v1616_v26 = vld [vmem:[%s3103_s9 + $0x8] sm:$0xff] }
 0xa99   :  { %vm934_vm3 = vcmp.eq.s32.totalorder %v2723_v41, 1 }
 0xb06   :  { %v896_v21 = vpop.permute.xlu0 %895 }
 0xb07   :  { %v2725_v35 = vmul.f32 %v2097_v45, %v896_v21  ;;  %v920_v39 = vpop.permute.xlu1 %919 }
 0xb08   :  { %v2728_v48 = vmul.f32 %v2099_v33, %v920_v39 }
 0xb09   :  { %v2735_v57 = vsel %vm927_vm2, %v2725_v35, %v2654_v6  ;;  %v182_v6 = vadd.f32 %v2390_v46, %v2409_v61 }
 0xb0a   :  { %956 = vrot.lane.b32.xlu0 %v2735_v57, %s2169_s23  ;;  %v2743_v5 = vsel %vm934_vm3, %v2728_v48, %v2662_v51  ;;  %v178_v51 = vadd.f32 %v2584_v24, %v2412_v63 }
 0xb0b   :  { %960 = vrot.lane.b32.xlu1 %v2743_v5, %s2171_s3 }
 0xb7c   :  { %v957_v45 = vpop.permute.xlu0 %956 }
 0xb7d   :  { %v961_v1 = vpop.permute.xlu1 %960 }
 0xb7e   :  { %v963_v33 = vsel %vm66_vm0, %v957_v45, %v961_v1 }
 0xb7f   :  { %1807 = vmatmul.mubr.msk.f32.vlgmr.msra.gmra.mrb[10].mxu0 %vm250_vm1, %v963_v33 }
 0xb80   :  { %1984 = vmatpush1.bf16.msra.mxu0 %v2289_v22  ;;  %1361 = vmatprep.mubr.f32.mxu0 %v2168_v3 }
 0xb81   :  { %1986 = vmatprep.subr.bf16.mxu0 %v2292_v23 }
 0xb84   :  { %1988 = vmatpush1.bf16.msra.mxu0 %v2317_v30 }
 0xb85   :  { %1990 = vmatprep.subr.bf16.mxu0 %v2320_v31 }
 0xb88   :  { %1992 = vmatpush1.bf16.msra.mxu0 %v2343_v37 }
 0xb89   :  { %1994 = vmatprep.subr.bf16.mxu0 %v2346_v38 }
 0xb8c   :  { %1996 = vmatpush1.bf16.msra.mxu0 %v2362_v42 }
 0xc52   :  { %v1033_v34 = vpop.f32.mrb[10].mxu0 }
 0xc53   :  { %v1039_v40 = vadd.f32 %v1033_v34, %v182_v6  ;;  %v1035_v17 = vpop.f32.mrb[11].mxu0  ;;  %v2771_v34 = vsel %vm927_vm2, %v2713_v27, %v2703_v12 }
 0xc54   :  { %v1041_v19 = vadd.f32 %v1035_v17, %v178_v51 }
 0xc55   :  { %2104 = vtanh.f32 %v1039_v40  ;;  %v1808_v28 = vmul.f32 -1.442695, %v1039_v40  ;;  %v2777_v40 = vsel %vm934_vm3, %v2715_v16, %v2709_v14 }
 0xc56   :  { %2106 = vtanh.f32 %v1041_v19  ;;  %v1809_v2 = vmul.f32 -1.442695, %v1041_v19 }
 0xc57   :  { %2108 = vpow2.f32 %v1808_v28 }
 0xc58   :  { %2110 = vpow2.f32 %v1809_v2 }
 0xc5f   :  { %v2105_v7 = vpop.eup %2104 }
 0xc60   :  { %v2107_v0 = vpop.eup %2106  ;;  %1051 = vrot.lane.b32.xlu0 %v2105_v7, %s2171_s3 }
 0xc61   :  { %1075 = vrot.lane.b32.xlu1 %v2107_v0, %s2171_s3  ;;  %v2109_v46 = vpop.eup %2108 }
 0xc62   :  { %v2111_v36 = vpop.eup %2110  ;;  %v1045_v21 = vadd.f32 1.0, %v2109_v46 }
 0xc63   :  { %v1069_v24 = vadd.f32 1.0, %v2111_v36 }
 0xc64   :  { %2112 = vrcp.f32 %v1045_v21 }
 0xc65   :  { %2114 = vrcp.f32 %v1069_v24 }
 0xc6e   :  { %v2113_v39 = vpop.eup %2112 }
 0xc6f   :  { %v2115_v1 = vpop.eup %2114  ;;  %v1049_v17 = vmul.f32 %v2113_v39, %v2771_v34 }
 0xc70   :  { %v1073_v7 = vmul.f32 %v2115_v1, %v2777_v40 }
 0xcd2   :  { %v1052_v45 = vpop.permute.xlu0 %1051 }
 0xcd3   :  { %v1054_v33 = vmul.f32 %v2113_v39, %v1052_v45  ;;  %v1076_v6 = vpop.permute.xlu1 %1075 }
 0xcd4   :  { %v1078_v51 = vmul.f32 %v2115_v1, %v1076_v6 }
 0xcd5   :  { %1056 = vrot.lane.b32.xlu0 %v1054_v33, %s2169_s23 }
 0xcd6   :  { %1080 = vrot.lane.b32.xlu1 %v1078_v51, %s2169_s23 }
 0xcd9   :  { %1092 = vperm.xlu0 %2039, %v2695_v44  }
 0xcda   :  { %1099 = vperm.xlu1 %2038, %v2692_v18  }
 0xd47   :  { %v1057_v19 = vpop.permute.xlu0 %1056 }
 0xd48   :  { %v2781_v44 = vadd.f32 %v1057_v19, %v1049_v17  ;;  %v1081_v18 = vpop.permute.xlu1 %1080 }
 0xd49   :  { %v2783_v0 = vadd.f32 %v1081_v18, %v1073_v7 }
 0xd4a   :  { %2116 = vtanh.f32 %v2781_v44 }
 0xd4b   :  { %2118 = vtanh.f32 %v2783_v0 }
 0xd54   :  { %v2117_v12 = vpop.eup %2116 }
 0xd55   :  { %v2119_v27 = vpop.eup %2118  ;;  %1062 = vrot.lane.b32.xlu0 %v2117_v12, %s2171_s3 }
 0xd56   :  { %1086 = vrot.lane.b32.xlu1 %v2119_v27, %s2171_s3 }
 0xd58   :  { %v2789_v14 = vpop.permute.xlu0 %1092 }
 0xd59   :  { %v2791_v16 = vpop.permute.xlu1 %1099  ;;  %vm1094_vm6 = vcmp.eq.s32.totalorder %v2789_v14, 1 }
 0xd5a   :  { %vm1101_vm7 = vcmp.eq.s32.totalorder %v2791_v16, 1  ;;  %v2839_v27 = vsel %vm1094_vm6, %v2781_v44, %v2771_v34  ;;  %v1618_v16 = vld [vmem:[%s3103_s9 + $0x18] sm:$0xff] }
 0xdc7   :  { %v1063_v28 = vpop.permute.xlu0 %1062 }
 0xdc8   :  { %v2793_v2 = vmul.f32 %v2113_v39, %v1063_v28  ;;  %v1087_v46 = vpop.permute.xlu1 %1086  ;;  %v2845_v28 = vsel %vm1101_vm7, %v2783_v0, %v2777_v40 }
 0xdc9   :  { %v2796_v36 = vmul.f32 %v2115_v1, %v1087_v46 }
 0xdca   :  { %v2803_v21 = vsel %vm1094_vm6, %v2793_v2, %v2735_v57  ;;  %v188_v57 = vadd.f32 %v2396_v50, %v2409_v61 }
 0xdcb   :  { %1121 = vrot.lane.b32.xlu0 %v2803_v21, %s2169_s23  ;;  %v2811_v24 = vsel %vm1101_vm7, %v2796_v36, %v2743_v5 }
 0xdcc   :  { %1125 = vrot.lane.b32.xlu1 %v2811_v24, %s2171_s3 }
 0xe3d   :  { %v1122_v39 = vpop.permute.xlu0 %1121 }
 0xe3e   :  { %v1126_v45 = vpop.permute.xlu1 %1125 }
 0xe3f   :  { %v1128_v1 = vsel %vm66_vm0, %v1122_v39, %v1126_v45 }
 0xe40   :  { %1812 = vmatmul.mubr.msk.f32.vlgmr.msra.gmra.mrb[14].mxu1 %vm250_vm1, %v1128_v1 }
 0xe41   :  { %2000 = vmatpush1.bf16.msra.mxu1 %v2289_v22  ;;  %1526 = vmatprep.mubr.f32.mxu1 %v2168_v3  ;;  %v172_v22 = vadd.f32 %v2580_v20, %v2412_v63 }
 0xe42   :  { %2002 = vmatprep.subr.bf16.mxu1 %v2292_v23 }
 0xe45   :  { %2004 = vmatpush1.bf16.msra.mxu1 %v2317_v30 }
 0xe46   :  { %2006 = vmatprep.subr.bf16.mxu1 %v2320_v31 }
 0xe49   :  { %2008 = vmatpush1.bf16.msra.mxu1 %v2343_v37 }
 0xe4a   :  { %2010 = vmatprep.subr.bf16.mxu1 %v2346_v38 }
 0xe4d   :  { %2012 = vmatpush1.bf16.msra.mxu1 %v2362_v42 }
 0xf13   :  { %v1198_v5 = vpop.f32.mrb[14].mxu1 }
 0xf14   :  { %v1204_v3 = vadd.f32 %v1198_v5, %v188_v57  ;;  %v1200_v33 = vpop.f32.mrb[15].mxu1 }
 0xf15   :  { %v1206_v23 = vadd.f32 %v1200_v33, %v172_v22 }
 0xf16   :  { %2120 = vtanh.f32 %v1204_v3  ;;  %v1813_v37 = vmul.f32 -1.442695, %v1204_v3 }
 0xf17   :  { %2122 = vtanh.f32 %v1206_v23  ;;  %v1814_v38 = vmul.f32 -1.442695, %v1206_v23 }
 0xf18   :  { %2124 = vpow2.f32 %v1813_v37 }
 0xf19   :  { %2126 = vpow2.f32 %v1814_v38  ;;  %v166_v38 = vadd.f32 %v2499_v9, %v2412_v63 }
 0xf20   :  { %v2121_v30 = vpop.eup %2120 }
 0xf21   :  { %v2123_v31 = vpop.eup %2122  ;;  %1216 = vrot.lane.b32.xlu0 %v2121_v30, %s2171_s3 }
 0xf22   :  { %1240 = vrot.lane.b32.xlu1 %v2123_v31, %s2171_s3  ;;  %v2125_v42 = vpop.eup %2124 }
 0xf23   :  { %v2127_v50 = vpop.eup %2126  ;;  %v1210_v6 = vadd.f32 1.0, %v2125_v42 }
 0xf24   :  { %v1234_v20 = vadd.f32 1.0, %v2127_v50 }
 0xf25   :  { %2128 = vrcp.f32 %v1210_v6 }
 0xf26   :  { %2130 = vrcp.f32 %v1234_v20 }
 0xf2f   :  { %v2129_v51 = vpop.eup %2128 }
 0xf30   :  { %v2131_v19 = vpop.eup %2130  ;;  %v1214_v46 = vmul.f32 %v2129_v51, %v2839_v27 }
 0xf31   :  { %v1238_v45 = vmul.f32 %v2131_v19, %v2845_v28 }
 0xf93   :  { %v1217_v17 = vpop.permute.xlu0 %1216 }
 0xf94   :  { %v1219_v7 = vmul.f32 %v2129_v51, %v1217_v17  ;;  %v1241_v18 = vpop.permute.xlu1 %1240 }
 0xf95   :  { %v1243_v12 = vmul.f32 %v2131_v19, %v1241_v18 }
 0xf96   :  { %1221 = vrot.lane.b32.xlu0 %v1219_v7, %s2169_s23 }
 0xf97   :  { %1245 = vrot.lane.b32.xlu1 %v1243_v12, %s2169_s23 }
 0xf9a   :  { %1257 = vperm.xlu0 %2039, %v2614_v53  }
 0xf9b   :  { %1264 = vperm.xlu1 %2038, %v2611_v25  }
0x1008   :  { %v1222_v39 = vpop.permute.xlu0 %1221 }
0x1009   :  { %v1224_v53 = vadd.f32 %v1222_v39, %v1214_v46  ;;  %v1246_v1 = vpop.permute.xlu1 %1245 }
0x100a   :  { %v1248_v25 = vadd.f32 %v1246_v1, %v1238_v45 }
0x100b   :  { %2132 = vtanh.f32 %v1224_v53 }
0x100c   :  { %2134 = vtanh.f32 %v1248_v25 }
0x1015   :  { %v2133_v57 = vpop.eup %2132 }
0x1016   :  { %v2135_v22 = vpop.eup %2134  ;;  %1227 = vrot.lane.b32.xlu0 %v2133_v57, %s2171_s3 }
0x1017   :  { %1251 = vrot.lane.b32.xlu1 %v2135_v22, %s2171_s3 }
0x1019   :  { %v2851_v34 = vpop.permute.xlu0 %1257 }
0x101a   :  { %v2853_v40 = vpop.permute.xlu1 %1264  ;;  %vm1259_vm10 = vcmp.eq.s32.totalorder %v2851_v34, 1  ;;  %v1621_v34 = vld [vmem:[%s3103_s9 + $0x30] sm:$0xff] }
0x101b   :  { %vm1266_vm11 = vcmp.eq.s32.totalorder %v2853_v40, 1  ;;  %v2892_v22 = vsel %vm1259_vm10, %v1224_v53, %v2839_v27 }
0x1088   :  { %v1228_v44 = vpop.permute.xlu0 %1227 }
0x1089   :  { %v2855_v0 = vmul.f32 %v2129_v51, %v1228_v44  ;;  %v1252_v5 = vpop.permute.xlu1 %1251  ;;  %v2897_v44 = vsel %vm1266_vm11, %v1248_v25, %v2845_v28 }
0x108a   :  { %v2858_v3 = vmul.f32 %v2131_v19, %v1252_v5 }
0x108b   :  { %v2865_v33 = vsel %vm1259_vm10, %v2855_v0, %v2803_v21  ;;  %v194_v21 = vadd.f32 %v2400_v52, %v2409_v61 }
0x108c   :  { %1286 = vrot.lane.b32.xlu0 %v2865_v33, %s2169_s23  ;;  %v2873_v23 = vsel %vm1266_vm11, %v2858_v3, %v2811_v24 }
0x108d   :  { %1290 = vrot.lane.b32.xlu1 %v2873_v23, %s2171_s3 }
0x10fe   :  { %v1287_v30 = vpop.permute.xlu0 %1286 }
0x10ff   :  { %v1291_v31 = vpop.permute.xlu1 %1290 }
0x1100   :  { %v1293_v37 = vsel %vm66_vm0, %v1287_v30, %v1291_v31 }
0x1101   :  { %1817 = vmatmul.mubr.msk.f32.vlgmr.msra.gmra.mrb[12].mxu0 %vm250_vm1, %v1293_v37 }
0x11d4   :  { %v1363_v42 = vpop.f32.mrb[12].mxu0 }
0x11d5   :  { %v1369_v50 = vadd.f32 %v1363_v42, %v194_v21  ;;  %v1365_v6 = vpop.f32.mrb[13].mxu0 }
0x11d6   :  { %v1371_v24 = vadd.f32 %v1365_v6, %v166_v38 }
0x11d7   :  { %2136 = vtanh.f32 %v1369_v50  ;;  %v1818_v17 = vmul.f32 -1.442695, %v1369_v50 }
0x11d8   :  { %2138 = vtanh.f32 %v1371_v24  ;;  %v1819_v19 = vmul.f32 -1.442695, %v1371_v24 }
0x11d9   :  { %2140 = vpow2.f32 %v1818_v17 }
0x11da   :  { %2142 = vpow2.f32 %v1819_v19  ;;  %v200_v19 = vadd.f32 %v2404_v54, %v2409_v61 }
0x11e1   :  { %v2137_v20 = vpop.eup %2136 }
0x11e2   :  { %v2139_v51 = vpop.eup %2138  ;;  %1381 = vrot.lane.b32.xlu0 %v2137_v20, %s2171_s3 }
0x11e3   :  { %1405 = vrot.lane.b32.xlu1 %v2139_v51, %s2171_s3  ;;  %v2141_v52 = vpop.eup %2140 }
0x11e4   :  { %v2143_v7 = vpop.eup %2142  ;;  %v1375_v18 = vadd.f32 1.0, %v2141_v52 }
0x11e5   :  { %v1399_v9 = vadd.f32 1.0, %v2143_v7 }
0x11e6   :  { %2144 = vrcp.f32 %v1375_v18 }
0x11e7   :  { %2146 = vrcp.f32 %v1399_v9 }
0x11f0   :  { %v2145_v12 = vpop.eup %2144 }
0x11f1   :  { %v2147_v39 = vpop.eup %2146  ;;  %v1379_v5 = vmul.f32 %v2145_v12, %v2892_v22 }
0x11f2   :  { %v1403_v31 = vmul.f32 %v2147_v39, %v2897_v44 }
0x1254   :  { %v1382_v46 = vpop.permute.xlu0 %1381 }
0x1255   :  { %v1384_v45 = vmul.f32 %v2145_v12, %v1382_v46  ;;  %v1406_v1 = vpop.permute.xlu1 %1405 }
0x1256   :  { %v1408_v57 = vmul.f32 %v2147_v39, %v1406_v1 }
0x1257   :  { %1386 = vrot.lane.b32.xlu0 %v1384_v45, %s2169_s23 }
0x1258   :  { %1410 = vrot.lane.b32.xlu1 %v1408_v57, %s2169_s23 }
0x125b   :  { %1422 = vperm.xlu0 %2039, %v2518_v47  }
0x125c   :  { %1429 = vperm.xlu1 %2038, %v2515_v43  }
0x12c9   :  { %v1387_v30 = vpop.permute.xlu0 %1386 }
0x12ca   :  { %v2901_v37 = vadd.f32 %v1387_v30, %v1379_v5  ;;  %v1411_v47 = vpop.permute.xlu1 %1410 }
0x12cb   :  { %v2903_v21 = vadd.f32 %v1411_v47, %v1403_v31  ;;  %v412_v47 = vsel %vm395_vm4, %v2468_v59, 0.0  ;;  %vm424_vm4 = vcmask 523520  }
0x12cc   :  { %2148 = vtanh.f32 %v2901_v37 }
0x12cd   :  { %2150 = vtanh.f32 %v2903_v21 }
0x12d6   :  { %v2149_v43 = vpop.eup %2148 }
0x12d7   :  { %v2151_v27 = vpop.eup %2150  ;;  %1392 = vrot.lane.b32.xlu0 %v2149_v43, %s2171_s3  ;;  %v762_v43 = vsel %vm752_vm12, %v2644_v60, 0.0 }
0x12d8   :  { %1416 = vrot.lane.b32.xlu1 %v2151_v27, %s2171_s3  ;;  %v1275_v27 = vsel %vm1266_vm11, %v2858_v3, 0.0 }
0x12da   :  { %v2909_v28 = vpop.permute.xlu0 %1422 }
0x12db   :  { %v2911_v53 = vpop.permute.xlu1 %1429  ;;  %vm1424_vm14 = vcmp.eq.s32.totalorder %v2909_v28, 1 }
0x12dc   :  { %vm1431_vm15 = vcmp.eq.s32.totalorder %v2911_v53, 1  ;;  %v1426_v59 = vsel %vm1424_vm14, %v2901_v37, %v2892_v22  ;;  %v587_v22 = vsel %vm577_vm8, %v2558_v13, 0.0  ;;  %v1110_v13 = vsel %vm1101_vm7, %v2796_v36, 0.0  ;;  %v1615_v53 = vld [vmem:[%s3103_s9] sm:$0xff] }
0x1349   :  { %v1393_v25 = vpop.permute.xlu0 %1392 }
0x134a   :  { %v2913_v38 = vmul.f32 %v2145_v12, %v1393_v25  ;;  %v1417_v42 = vpop.permute.xlu1 %1416 }
0x134b   :  { %v2916_v50 = vmul.f32 %v2147_v39, %v1417_v42 }
0x134c   :  { %v1425_v6 = vsel %vm1424_vm14, %v2913_v38, %v2865_v33  ;;  %v160_v33 = vadd.f32 %v2394_v49, %v2412_v63  ;;  %v1434_v14 = vsel %vm1424_vm14, %v2913_v38, 0.0 }
0x134d   :  { %1451 = vrot.lane.b32.xlu0 %v1425_v6, %s2169_s23  ;;  %v1432_v24 = vsel %vm1431_vm15, %v2916_v50, %v2873_v23  ;;  %v1440_v42 = vsel %vm1431_vm15, %v2916_v50, 0.0  ;;  %v2013_v50 = vpack.c.bf16 %v1616_v26, %v1615_v53 }
0x134e   :  { %1455 = vrot.lane.b32.xlu1 %v1432_v24, %s2171_s3  ;;  %v937_v24 = vsel %vm927_vm2, %v2725_v35, 0.0  ;;  %v1617_v35 = vld [vmem:[%s3103_s9 + $0x10] sm:$0xff] }
0x134f   :  { %v2017_v36 = vpack.c.bf16 %v1618_v16, %v1617_v35  ;;  %2014 = vmatprep.subr.bf16.mxu0 %v2013_v50 }
0x1350   :  { %2016 = vmatpush3.bf16.msra.mxu0 %v2013_v50 }
0x1351   :  { %2018 = vmatprep.subr.bf16.mxu0 %v2017_v36 }
0x1354   :  { %2020 = vmatpush3.bf16.msra.mxu0 %v2017_v36 }
0x13bf   :  { %v1452_v20 = vpop.permute.xlu0 %1451 }
0x13c0   :  { %v1456_v51 = vpop.permute.xlu1 %1455 }
0x13c1   :  { %v1458_v17 = vsel %vm66_vm0, %v1452_v20, %v1456_v51  ;;  %v769_v51 = vsel %vm759_vm13, %v2647_v4, 0.0  ;;  %v1620_v4 = vld [vmem:[%s3103_s9 + $0x28] sm:$0xff] }
0x13c2   :  { %1821 = vmatmul.mubr.msk.f32.vlgmr.msra.gmra.mrb[16].mxu1 %vm250_vm1, %v1458_v17  ;;  %v1269_v17 = vsel %vm1259_vm10, %v2855_v0, 0.0 }
0x1495   :  { %v1528_v52 = vpop.f32.mrb[16].mxu1 }
0x1496   :  { %v1534_v7 = vadd.f32 %v1528_v52, %v200_v19  ;;  %v1530_v18 = vpop.f32.mrb[17].mxu1  ;;  %v418_v19 = vsel %vm406_vm5, %v2478_v62, 0.0  ;;  %v2025_v62 = vpack.c.bf16 %v1622_v56, %v1621_v34 }
0x1497   :  { %v1536_v9 = vadd.f32 %v1530_v18, %v160_v33  ;;  %v2021_v33 = vpack.c.bf16 %v1620_v4, %v1619_v8 }
0x1498   :  { %2152 = vtanh.f32 %v1534_v7  ;;  %v1822_v46 = vmul.f32 -1.442695, %v1534_v7 }
0x1499   :  { %2154 = vtanh.f32 %v1536_v9  ;;  %v1823_v39 = vmul.f32 -1.442695, %v1536_v9  ;;  %2022 = vmatprep.subr.bf16.mxu0 %v2021_v33 }
0x149a   :  { %2156 = vpow2.f32 %v1822_v46  ;;  %2024 = vmatpush3.bf16.msra.mxu0 %v2021_v33 }
0x149b   :  { %2158 = vpow2.f32 %v1823_v39  ;;  %2026 = vmatprep.subr.bf16.mxu0 %v2025_v62  ;;  %v594_v39 = vsel %vm584_vm9, %v2561_v15, 0.0 }
0x149e   :  { %2028 = vmatpush3.bf16.msra.mxu0 %v2025_v62 }
0x14a2   :  { %v2153_v23 = vpop.eup %2152 }
0x14a3   :  { %v2155_v12 = vpop.eup %2154  ;;  %1546 = vrot.lane.b32.xlu1 %v2153_v23, %s2171_s3 }
0x14a4   :  { %1570 = vrot.lane.b32.xlu0 %v2155_v12, %s2171_s3  ;;  %v2157_v54 = vpop.eup %2156  ;;  %v1104_v12 = vsel %vm1094_vm6, %v2793_v2, 0.0 }
0x14a5   :  { %v2159_v61 = vpop.eup %2158  ;;  %v1540_v45 = vadd.f32 1.0, %v2157_v54 }
0x14a6   :  { %v1564_v49 = vadd.f32 1.0, %v2159_v61 }
0x14a7   :  { %2160 = vrcp.f32 %v1540_v45 }
0x14a8   :  { %2162 = vrcp.f32 %v1564_v49 }
0x14b1   :  { %v2937_v63 = vpop.eup %2160 }
0x14b2   :  { %v2939_v57 = vpop.eup %2162  ;;  %v1544_v40 = vmul.f32 %v2937_v63, %v1426_v59 }
0x1515   :  { %v1547_v1 = vpop.permute.xlu1 %1546 }
0x1516   :  { %v1549_v5 = vmul.f32 %v2937_v63, %v1547_v1  ;;  %v1571_v30 = vpop.permute.xlu0 %1570 }
0x1517   :  { %v1573_v31 = vmul.f32 %v2939_v57, %v1571_v30 }
0x1518   :  { %1551 = vrot.lane.b32.xlu1 %v1549_v5, %s2169_s23 }
0x1519   :  { %1575 = vrot.lane.b32.xlu0 %v1573_v31, %s2169_s23 }
0x151d   :  { %1598 = vperm.xlu0 %2039, %v2436_v29   ;;  %v944_v29 = vsel %vm934_vm3, %v2728_v48, 0.0 }
0x1521   :  { %1587 = vperm.xlu0 %2039, %v2439_v32   ;;  %v1433_v32 = vsel %vm1431_vm15, %v2903_v21, %v2897_v44 }
0x1522   :  { %v1568_v55 = vmul.f32 %v2939_v57, %v1433_v32  ;;  %v1824_v32 = vld [vmem:[%s3104_s10] ss:$0 sm:$0xff] }
0x1525   :  { %414 = vrot.lane.b32.xlu0 %v412_v47, %s2169_s23 }
0x1529   :  { %764 = vrot.lane.b32.xlu0 %v762_v43, %s2169_s23 }
0x152d   :  { %1277 = vrot.lane.b32.xlu0 %v1275_v27, %s2171_s3 }
0x1531   :  { %946 = vrot.lane.b32.xlu0 %v944_v29, %s2171_s3 }
0x158a   :  { %v1552_v58 = vpop.permute.xlu1 %1551 }
0x158b   :  { %v1576_v60 = vpop.permute.xlu0 %1575  ;;  %v1554_v48 = vadd.f32 %v1552_v58, %v1544_v40 }
0x158c   :  { %v1578_v41 = vadd.f32 %v1576_v60, %v1568_v55 }
0x158e   :  { %2164 = vtanh.f32 %v1578_v41 }
0x158f   :  { %2166 = vtanh.f32 %v1554_v48 }
0x1598   :  { %v2165_v3 = vpop.eup %2164 }
0x1599   :  { %1581 = vrot.lane.b32.xlu1 %v2165_v3, %s2171_s3  ;;  %v2167_v25 = vpop.eup %2166 }
0x159c   :  { %v1599_v44 = vpop.permute.xlu0 %1598 }
0x159d   :  { %1557 = vrot.lane.b32.xlu1 %v2167_v25, %s2171_s3  ;;  %vm1600_vm5 = vcmp.eq.s32.totalorder %v1599_v44, 1 }
0x15a0   :  { %v1588_v21 = vpop.permute.xlu0 %1587 }
0x15a1   :  { %589 = vrot.lane.b32.xlu1 %v587_v22, %s2169_s23  ;;  %vm1589_vm8 = vcmp.eq.s32.totalorder %v1588_v21, 1 }
0x15a4   :  { %v415_v37 = vpop.permute.xlu0 %414 }
0x15a5   :  { %417 = vst.msk [vmem:[#allocation3] sm:$0xff] %vm66_vm0, %v415_v37  ;;  %1442 = vrot.lane.b32.xlu1 %v1440_v42, %s2171_s3 }
0x15a8   :  { %v765_v6 = vpop.permute.xlu0 %764 }
0x15a9   :  { %768 = vst.msk [vmem:[#allocation3 + $0x10] sm:$0xff] %vm66_vm0, %v765_v6  ;;  %939 = vrot.lane.b32.xlu1 %v937_v24, %s2169_s23 }
0x15ac   :  { %v1278_v10 = vpop.permute.xlu0 %1277 }
0x15ad   :  { %1280 = vst.msk [vmem:[#allocation3 + $0x10] sm:$0xff] %vm424_vm4, %v1278_v10  ;;  %1112 = vrot.lane.b32.xlu1 %v1110_v13, %s2171_s3 }
0x15b0   :  { %v947_v20 = vpop.permute.xlu0 %946 }
0x15b1   :  { %950 = vst.msk [vmem:[#allocation3 + $0x20] sm:$0xff] %vm424_vm4, %v947_v20  ;;  %771 = vrot.lane.b32.xlu1 %v769_v51, %s2171_s3 }
0x15b4   :  { %v1609_v5 = vld [vmem:[#allocation3 + $0x10] sm:$0xff] }
0x15b5   :  { %1271 = vrot.lane.b32.xlu1 %v1269_v17, %s2169_s23 }
0x15b9   :  { %420 = vrot.lane.b32.xlu1 %v418_v19, %s2171_s3 }
0x160b   :  { %v1582_v0 = vpop.permute.xlu1 %1581 }
0x160c   :  { %v1584_v52 = vmul.f32 %v2939_v57, %v1582_v0 }
0x160e   :  { %v1601_v7 = vsel %vm1600_vm5, %v1584_v52, 0.0 }
0x160f   :  { %1603 = vrot.lane.b32.xlu0 %v1601_v7, %s2171_s3  ;;  %v1558_v18 = vpop.permute.xlu1 %1557 }
0x1610   :  { %v1560_v9 = vmul.f32 %v2937_v63, %v1558_v18 }
0x1612   :  { %v1590_v23 = vsel %vm1589_vm8, %v1560_v9, 0.0 }
0x1613   :  { %1106 = vrot.lane.b32.xlu0 %v1104_v12, %s2169_s23  ;;  %1592 = vrot.lane.b32.xlu1 %v1590_v23, %s2169_s23  ;;  %v590_v46 = vpop.permute.xlu1 %589 }
0x1614   :  { %593 = vst.msk [vmem:[#allocation3 + $0x8] sm:$0xff] %vm66_vm0, %v590_v46 }
0x1617   :  { %596 = vrot.lane.b32.xlu0 %v594_v39, %s2171_s3  ;;  %v1443_v54 = vpop.permute.xlu1 %1442 }
0x1618   :  { %1445 = vst.msk [vmem:[#allocation3 + $0x8] sm:$0xff] %vm424_vm4, %v1443_v54 }
0x161b   :  { %1436 = vrot.lane.b32.xlu0 %v1434_v14, %s2169_s23  ;;  %v940_v2 = vpop.permute.xlu1 %939 }
0x161c   :  { %943 = vst.msk [vmem:[#allocation3 + $0x18] sm:$0xff] %vm66_vm0, %v940_v2 }
0x161f   :  { %v1113_v61 = vpop.permute.xlu1 %1112  ;;  %v1608_v57 = vld [vmem:[#allocation3 + $0x8] sm:$0xff] }
0x1620   :  { %1115 = vst.msk [vmem:[#allocation3 + $0x18] sm:$0xff] %vm424_vm4, %v1113_v61 }
0x1623   :  { %v772_v45 = vpop.permute.xlu1 %771 }
0x1624   :  { %775 = vst.msk [vmem:[#allocation3 + $0x28] sm:$0xff] %vm424_vm4, %v772_v45 }
0x1627   :  { %v1272_v11 = vpop.permute.xlu1 %1271  ;;  %v1610_v31 = vld [vmem:[#allocation3 + $0x18] sm:$0xff] }
0x1628   :  { %1274 = vst.msk [vmem:[#allocation3 + $0x28] sm:$0xff] %vm66_vm0, %v1272_v11 }
0x162b   :  { %v421_v15 = vpop.permute.xlu1 %420 }
0x162c   :  { %425 = vst.msk [vmem:[#allocation3 + $0x38] sm:$0xff] %vm424_vm4, %v421_v15 }
0x162f   :  { %v1612_v43 = vld [vmem:[#allocation3 + $0x28] sm:$0xff] }
0x1681   :  { %v1604_v49 = vpop.permute.xlu0 %1603 }
0x1682   :  { %1606 = vst.msk [vmem:[#allocation3] sm:$0xff] %vm424_vm4, %v1604_v49 }
0x1685   :  { %v1107_v28 = vpop.permute.xlu0 %1106  ;;  %v1593_v38 = vpop.permute.xlu1 %1592 }
0x1686   :  { %1109 = vst.msk [vmem:[#allocation3 + $0x20] sm:$0xff] %vm66_vm0, %v1107_v28  ;;  %1595 = vst.msk [vmem:[#allocation3 + $0x38] sm:$0xff] %vm66_vm0, %v1593_v38 }
0x1689   :  { %v597_v63 = vpop.permute.xlu0 %596  ;;  %v1607_v1 = vld [vmem:[#allocation3] sm:$0xff] }
0x168a   :  { %600 = vst.msk [vmem:[#allocation3 + $0x30] sm:$0xff] %vm424_vm4, %v597_v63  ;;  %1865 = vmatprep.mubr.msk.f32.mxu0 %vm250_vm1, %v1607_v1 }
0x168b   :  { %1866 = vmatmul.mubr.msk.f32.vlgmr.msra.gmra.mrb[14].mxu0 %vm250_vm1, %v1608_v57 }
0x168c   :  { %1868 = vmatprep.mubr.msk.f32.mxu0 %vm250_vm1, %v1609_v5 }
0x168d   :  { %v1437_v30 = vpop.permute.xlu0 %1436  ;;  %v1611_v47 = vld [vmem:[#allocation3 + $0x20] sm:$0xff]  ;;  %v1614_v29 = vld [vmem:[#allocation3 + $0x38] sm:$0xff] }
0x168e   :  { %1439 = vst.msk [vmem:[#allocation3 + $0x30] sm:$0xff] %vm66_vm0, %v1437_v30 }
0x168f   :  { %1869 = vmatmul.mubr.msk.f32.gmra.mrb[16].mxu0 %vm250_vm1, %v1610_v31 }
0x1690   :  { %1871 = vmatprep.mubr.msk.f32.mxu0 %vm250_vm1, %v1611_v47 }
0x1693   :  { %1872 = vmatmul.mubr.msk.f32.gmra.mrb[18].mxu0 %vm250_vm1, %v1612_v43 }
0x1695   :  { %v1613_v27 = vld [vmem:[#allocation3 + $0x30] sm:$0xff] }
0x1696   :  { %1874 = vmatprep.mubr.msk.f32.mxu0 %vm250_vm1, %v1613_v27 }
0x1697   :  { %1875 = vmatmul.mubr.msk.f32.gmra.mrb[20].mxu0 %vm250_vm1, %v1614_v29 }
0x175e   :  { %v1867_v55 = vpop.f32.mrb[14].mxu0 }
0x175f   :  { %v1726_v59 = vadd.f32 %v1867_v55, %v1824_v32  ;;  %v1720_v58 = vpop.f32.mrb[15].mxu0 }
0x1760   :  { %v1721_v60 = vadd.f32 %v1824_v32, %v1720_v58 }
0x1761   :  { %1760 = vst [vmem:[%s3105_s11 + $0x8] sm:$0xff] %v1726_v59 }
0x1762   :  { %1759 = vst [vmem:[%s3105_s11] sm:$0xff] %v1721_v60  ;;  %v1870_v40 = vpop.f32.mrb[16].mxu0 }
0x1763   :  { %v1736_v41 = vadd.f32 %v1870_v40, %v1824_v32  ;;  %v1730_v48 = vpop.f32.mrb[17].mxu0 }
0x1764   :  { %v1731_v3 = vadd.f32 %v1824_v32, %v1730_v48 }
0x1765   :  { %1762 = vst [vmem:[%s3105_s11 + $0x18] sm:$0xff] %v1736_v41 }
0x1766   :  { %1761 = vst [vmem:[%s3105_s11 + $0x10] sm:$0xff] %v1731_v3  ;;  %v1873_v25 = vpop.f32.mrb[18].mxu0 }
0x1767   :  { %v1746_v44 = vadd.f32 %v1873_v25, %v1824_v32  ;;  %v1740_v21 = vpop.f32.mrb[19].mxu0 }
0x1768   :  { %v1741_v22 = vadd.f32 %v1824_v32, %v1740_v21 }
0x1769   :  { %1764 = vst [vmem:[%s3105_s11 + $0x28] sm:$0xff] %v1746_v44 }
0x176a   :  { %1763 = vst [vmem:[%s3105_s11 + $0x20] sm:$0xff] %v1741_v22  ;;  %v1876_v37 = vpop.f32.mrb[20].mxu0 }
0x176b   :  { %v1756_v42 = vadd.f32 %v1876_v37, %v1824_v32  ;;  %v1750_v6 = vpop.f32.mrb[21].mxu0 }
0x176c   :  { %v1751_v24 = vadd.f32 %v1824_v32, %v1750_v6 }
0x176d   :  { %1766 = vst [vmem:[%s3105_s11 + $0x38] sm:$0xff] %v1756_v42 }
0x176e   :  { %1765 = vst [vmem:[%s3105_s11 + $0x30] sm:$0xff] %v1751_v24 }

</bundles_post_ra>
